<compile_context>
chip_gen: v6e
topology: v6e:2x2x1
jax: 0.10.0
libtpu: 0.0.40
codegen_flags: <defaults>
</compile_context>

<pallas_src>
import functools

import jax
import jax.numpy as jnp
from jax.experimental import pallas as pl
from jax.experimental.pallas import tpu as pltpu

EPS = 1e-5  # nn.BatchNorm2d default eps


# ------------------------------ Pallas kernel -------------------------------- #
def _per_channel_total(v, c, wc):
    """v: (1, wc) with lane index = w*c + channel.  Returns, broadcast to every lane,
    the total over the W copies of each channel (exact f32 adds on XLU rolls).
    Requires wc // c (== W) to be a power of two (checked by the caller)."""
    acc = v
    shift = c
    while shift < wc:
        acc = acc + pltpu.roll(acc, shift=shift, axis=1)
        shift *= 2
    return acc


def _fused_block4_kernel(xpad_ref, w1_ref, w2_ref, pwc_ref, o_ref, y1pad_ref,
                         *, N, H, W, Cin, C):
    NH, WC, WCin = N * H, W * C, W * Cin
    inv_m = 1.0 / float(N * H * W)

    pwc = pwc_ref[...]                        # (6, W*C) f32: per-channel params tiled over W
    b1, g1, be1 = pwc[0:1, :], pwc[1:2, :], pwc[2:3, :]
    b2, g2, be2 = pwc[3:4, :], pwc[4:5, :], pwc[5:6, :]

    # ---------------- conv1: 9 shifted-window GEMMs (bf16 in / f32 acc) -------- #
    xpad = xpad_ref[...]                      # (N, H+2, (W+2)*Cin) f32
    acc = jnp.zeros((NH, WC), jnp.float32)
    for ky in range(3):
        for kx in range(3):
            patch = xpad[:, ky:ky + H, kx * Cin:(kx + W) * Cin]      # (N, H, W*Cin)
            patch = patch.reshape(NH, WCin).astype(jnp.bfloat16)
            acc = acc + jnp.dot(patch, w1_ref[3 * ky + kx],
                                preferred_element_type=jnp.float32)
    acc = acc + b1                            # conv bias

    # ---------------- BN1 (training-mode batch stats) + ReLU ------------------- #
    tot = _per_channel_total(jnp.sum(acc, axis=0, keepdims=True), C, WC)
    mean = tot * inv_m
    d = acc - mean
    ssq = _per_channel_total(jnp.sum(d * d, axis=0, keepdims=True), C, WC)
    inv_std = jax.lax.rsqrt(ssq * inv_m + EPS)
    y1 = jnp.maximum(d * (inv_std * g1) + be1, 0.0)                   # (NH, WC)

    # ------------ keep y1 in VMEM: write into zero-padded scratch (halo) ------- #
    y1pad_ref[...] = jnp.zeros_like(y1pad_ref)
    y1pad_ref[:, 1:H + 1, C:(W + 1) * C] = y1.reshape(N, H, WC)

    # ---------------- conv2 ----------------------------------------------------- #
    y1p = y1pad_ref[...]                      # (N, H+2, (W+2)*C) f32
    acc2 = jnp.zeros((NH, WC), jnp.float32)
    for ky in range(3):
        for kx in range(3):
            patch = y1p[:, ky:ky + H, kx * C:(kx + W) * C]            # (N, H, W*C)
            patch = patch.reshape(NH, WC).astype(jnp.bfloat16)
            acc2 = acc2 + jnp.dot(patch, w2_ref[3 * ky + kx],
                                  preferred_element_type=jnp.float32)
    acc2 = acc2 + b2

    # ---------------- BN2 (no relu) --------------------------------------------- #
    tot2 = _per_channel_total(jnp.sum(acc2, axis=0, keepdims=True), C, WC)
    mean2 = tot2 * inv_m
    d2 = acc2 - mean2
    ssq2 = _per_channel_total(jnp.sum(d2 * d2, axis=0, keepdims=True), C, WC)
    inv_std2 = jax.lax.rsqrt(ssq2 * inv_m + EPS)
    o_ref[...] = d2 * (inv_std2 * g2) + be2


# ------------------------ hoisted parameter packing -------------------------- #
def _lane_dense_conv_weight(w_oihw, width):
    """(Cout, Cin, 3, 3) torch conv weight -> (9, W*Cin, W*Cout) bf16 per-tap
    block-diagonal GEMM weights for the lane-dense (N*H, W*C) activation layout."""
    cout, cin = int(w_oihw.shape[0]), int(w_oihw.shape[1])
    taps = jnp.transpose(w_oihw, (2, 3, 1, 0)).reshape(9, cin, cout)   # (tap, cin, cout)
    eye = jnp.eye(width, dtype=w_oihw.dtype)
    big = jnp.einsum("wv,tio->twivo", eye, taps)                        # (9, W, Cin, W, Cout)
    return big.reshape(9, width * cin, width * cout).astype(jnp.bfloat16)


def prepare_params(params, width):
    """Call-once packing of all weights / per-channel params into kernel layout."""
    w1_big = _lane_dense_conv_weight(params["w1"], width)
    w2_big = _lane_dense_conv_weight(params["w2"], width)
    pp = jnp.stack([params["b1"], params["g1"], params["beta1"],
                    params["b2"], params["g2"], params["beta2"]], axis=0)  # (6, C)
    pwc = jnp.tile(pp.astype(jnp.float32), (1, width))                     # (6, W*C)
    return w1_big, w2_big, pwc


# --------------------------------- wrapper ------------------------------------ #
@jax.jit
def block_type4_forward(x_nchw, w1_big, w2_big, pwc):
    N, Cin, H, W = x_nchw.shape
    WC = pwc.shape[1]
    C = WC // W
    NH = N * H

    xpad = jnp.pad(jnp.transpose(x_nchw, (0, 2, 3, 1)),
                   ((0, 0), (1, 1), (1, 1), (0, 0)))
    xpad = xpad.reshape(N, H + 2, (W + 2) * Cin)

    flops = 9 * 2 * NH * (W * Cin) * WC + 9 * 2 * NH * WC * WC
    bytes_accessed = (xpad.size * 4 + w1_big.size * 2 + w2_big.size * 2
                      + pwc.size * 4 + NH * WC * 4)

    vspec = pl.BlockSpec(memory_space=pltpu.MemorySpace.VMEM)
    out_flat = pl.pallas_call(
        functools.partial(_fused_block4_kernel, N=N, H=H, W=W, Cin=Cin, C=C),
        out_shape=jax.ShapeDtypeStruct((NH, WC), jnp.float32),
        in_specs=[vspec, vspec, vspec, vspec],
        out_specs=vspec,
        scratch_shapes=[pltpu.VMEM((N, H + 2, (W + 2) * C), jnp.float32)],
        compiler_params=pltpu.CompilerParams(vmem_limit_bytes=32 * 1024 * 1024),
        cost_estimate=pl.CostEstimate(flops=flops, transcendentals=2 * WC,
                                      bytes_accessed=bytes_accessed),
    )(xpad, w1_big, w2_big, pwc)

    return jnp.transpose(out_flat.reshape(N, H, W, C), (0, 3, 1, 2))   # back to NCHW


# ----------------------------- pure-JAX reference ------------------------------ #
def ref_forward(x_nchw, params, *, conv_input_dtype=jnp.float32):
    """Reference.  conv_input_dtype=bfloat16 reproduces the kernel's bf16-in /
    f32-accumulate MXU numerics (inputs rounded, products+sums exact in f32)."""
    def conv(x_nhwc, w_oihw, b):
        w_hwio = jnp.transpose(w_oihw, (2, 3, 1, 0))
        xc = x_nhwc.astype(conv_input_dtype).astype(jnp.float32)
        wc = w_hwio.astype(conv_input_dtype).astype(jnp.float32)
        y = jax.lax.conv_general_dilated(
            xc, wc, window_strides=(1, 1), padding="SAME",
            dimension_numbers=("NHWC", "HWIO", "NHWC"),
            precision=jax.lax.Precision.HIGHEST)
        return y + b

    def bn(y, g, beta):
        mean = jnp.mean(y, axis=(0, 1, 2), keepdims=True)
        var = jnp.mean(jnp.square(y - mean), axis=(0, 1, 2), keepdims=True)
        return (y - mean) * jax.lax.rsqrt(var + EPS) * g + beta

    x = jnp.transpose(x_nchw, (0, 2, 3, 1))
    y = jnp.maximum(bn(conv(x, params["w1"], params["b1"]),
                       params["g1"], params["beta1"]), 0.0)
    y = bn(conv(y, params["w2"], params["b2"]), params["g2"], params["beta2"])
    return jnp.transpose(y, (0, 3, 1, 2))


# ----------------------------------- main -------------------------------------- #
if __name__ == "__main__":
    N, Cin, H, W = 2, 4, 16, 16
    planes = 8
    assert (W & (W - 1)) == 0, "roll-based per-channel reduction assumes power-of-two W"

    key = jax.random.PRNGKey(0)
    ks = jax.random.split(key, 9)
    params = {
        # conv3x3(inplanes, planes)
        "w1": 0.2 * jax.random.normal(ks[0], (planes, Cin, 3, 3), jnp.float32),
        "b1": 0.1 * jax.random.normal(ks[1], (planes,), jnp.float32),
        # bn1 of BlockType1
        "g1": 1.0 + 0.1 * jax.random.normal(ks[2], (planes,), jnp.float32),
        "beta1": 0.1 * jax.random.normal(ks[3], (planes,), jnp.float32),
        # conv3x3(planes, planes)
        "w2": 0.2 * jax.random.normal(ks[4], (planes, planes, 3, 3), jnp.float32),
        "b2": 0.1 * jax.random.normal(ks[5], (planes,), jnp.float32),
        # bn1 of BlockType4
        "g2": 1.0 + 0.1 * jax.random.normal(ks[6], (planes,), jnp.float32),
        "beta2": 0.1 * jax.random.normal(ks[7], (planes,), jnp.float32),
    }
    # TODO(synk): BatchNorm running-stat updates (running_mean/var, momentum) are
    # training-time state mutation, not part of the forward output; not modeled.

    x = jax.random.normal(ks[8], (N, Cin, H, W), jnp.float32)

    # Hoisted, one-time packing of weights / per-channel params into kernel layout.
    w1_big, w2_big, pwc = prepare_params(params, W)

    out = jax.block_until_ready(block_type4_forward(x, w1_big, w2_big, pwc))
    assert out.shape == (N, planes, H, W), out.shape

    # 1) Tight check against a reference with the SAME bf16-in / f32-acc conv numerics:
    #    validates the fused conv / BN(batch-stats) / ReLU logic itself.
    ref_matched = jax.block_until_ready(
        ref_forward(x, params, conv_input_dtype=jnp.bfloat16))
    err_m = float(jnp.max(jnp.abs(out - ref_matched)))
    assert jnp.allclose(out, ref_matched, atol=1e-2, rtol=1e-2), err_m

    # 2) Looser check against the full-f32 PyTorch-semantics reference: bounds the
    #    impact of the intentional bf16 MXU-input path (perf review: drop HIGHEST;
    #    two chained conv+BN layers give |err| ~ 3e-2 worst case post-normalization).
    ref_f32 = jax.block_until_ready(ref_forward(x, params))
    err_f = float(jnp.max(jnp.abs(out - ref_f32)))
    assert jnp.allclose(out, ref_f32, atol=1e-1, rtol=1e-1), err_f

    print("KERNEL_OK")
</pallas_src>

<mosaic_0001>
module attributes {stable_mosaic.version = 11 : i64} {
  func.func @_fused_block4_kernel(%arg0: memref<2x18x72xf32, #tpu.memory_space<vmem>>, %arg1: memref<9x64x128xbf16, #tpu.memory_space<vmem>>, %arg2: memref<9x128x128xbf16, #tpu.memory_space<vmem>>, %arg3: memref<6x128xf32, #tpu.memory_space<vmem>>, %arg4: memref<32x128xf32, #tpu.memory_space<vmem>>, %arg5: memref<2x18x144xf32, #tpu.memory_space<vmem>>) attributes {dimension_semantics = [], scalar_prefetch = 0 : i64, scratch_operands = 1 : i64, tpu.core_type = #tpu.core_type<tc>} {
    %c0 = arith.constant 0 : index
    %c0_0 = arith.constant 0 : index
    %0 = vector.load %arg3[%c0, %c0_0] : memref<6x128xf32, #tpu.memory_space<vmem>>, vector<6x128xf32>
    %1 = vector.extract_strided_slice %0 {offsets = [0, 0], sizes = [1, 128], strides = [1, 1]} : vector<6x128xf32> to vector<1x128xf32>
    %2 = vector.extract_strided_slice %0 {offsets = [1, 0], sizes = [1, 128], strides = [1, 1]} : vector<6x128xf32> to vector<1x128xf32>
    %3 = vector.extract_strided_slice %0 {offsets = [2, 0], sizes = [1, 128], strides = [1, 1]} : vector<6x128xf32> to vector<1x128xf32>
    %4 = vector.extract_strided_slice %0 {offsets = [3, 0], sizes = [1, 128], strides = [1, 1]} : vector<6x128xf32> to vector<1x128xf32>
    %5 = vector.extract_strided_slice %0 {offsets = [4, 0], sizes = [1, 128], strides = [1, 1]} : vector<6x128xf32> to vector<1x128xf32>
    %6 = vector.extract_strided_slice %0 {offsets = [5, 0], sizes = [1, 128], strides = [1, 1]} : vector<6x128xf32> to vector<1x128xf32>
    %c0_1 = arith.constant 0 : index
    %c0_2 = arith.constant 0 : index
    %c0_3 = arith.constant 0 : index
    %7 = vector.load %arg0[%c0_1, %c0_2, %c0_3] : memref<2x18x72xf32, #tpu.memory_space<vmem>>, vector<2x18x72xf32>
    %cst = arith.constant 0.000000e+00 : f32
    %8 = vector.broadcast %cst : f32 to vector<32x128xf32>
    %9 = vector.extract_strided_slice %7 {offsets = [0, 0, 0], sizes = [2, 16, 64], strides = [1, 1, 1]} : vector<2x18x72xf32> to vector<2x16x64xf32>
    %10 = vector.shape_cast %9 : vector<2x16x64xf32> to vector<32x64xf32>
    %11 = arith.truncf %10 : vector<32x64xf32> to vector<32x64xbf16>
    %c0_4 = arith.constant 0 : index
    %c0_5 = arith.constant 0 : index
    %c0_6 = arith.constant 0 : index
    %12 = vector.load %arg1[%c0_4, %c0_5, %c0_6] : memref<9x64x128xbf16, #tpu.memory_space<vmem>>, vector<1x64x128xbf16>
    %13 = vector.shape_cast %12 : vector<1x64x128xbf16> to vector<64x128xbf16>
    %cst_7 = arith.constant dense<0.000000e+00> : vector<32x128xf32>
    %14 = tpu.matmul %11, %13, %cst_7 {dimension_numbers = #tpu.dot_dimension_numbers<[1], [0], [0], [1], [0, 0, 1, 1], [], []>} : vector<32x64xbf16>, vector<64x128xbf16>, vector<32x128xf32> -> vector<32x128xf32>
    %15 = arith.addf %8, %14 : vector<32x128xf32>
    %16 = vector.extract_strided_slice %7 {offsets = [0, 0, 4], sizes = [2, 16, 64], strides = [1, 1, 1]} : vector<2x18x72xf32> to vector<2x16x64xf32>
    %17 = vector.shape_cast %16 : vector<2x16x64xf32> to vector<32x64xf32>
    %18 = arith.truncf %17 : vector<32x64xf32> to vector<32x64xbf16>
    %c1 = arith.constant 1 : index
    %c0_8 = arith.constant 0 : index
    %c0_9 = arith.constant 0 : index
    %19 = vector.load %arg1[%c1, %c0_8, %c0_9] : memref<9x64x128xbf16, #tpu.memory_space<vmem>>, vector<1x64x128xbf16>
    %20 = vector.shape_cast %19 : vector<1x64x128xbf16> to vector<64x128xbf16>
    %cst_10 = arith.constant dense<0.000000e+00> : vector<32x128xf32>
    %21 = tpu.matmul %18, %20, %cst_10 {dimension_numbers = #tpu.dot_dimension_numbers<[1], [0], [0], [1], [0, 0, 1, 1], [], []>} : vector<32x64xbf16>, vector<64x128xbf16>, vector<32x128xf32> -> vector<32x128xf32>
    %22 = arith.addf %15, %21 : vector<32x128xf32>
    %23 = vector.extract_strided_slice %7 {offsets = [0, 0, 8], sizes = [2, 16, 64], strides = [1, 1, 1]} : vector<2x18x72xf32> to vector<2x16x64xf32>
    %24 = vector.shape_cast %23 : vector<2x16x64xf32> to vector<32x64xf32>
    %25 = arith.truncf %24 : vector<32x64xf32> to vector<32x64xbf16>
    %c2 = arith.constant 2 : index
    %c0_11 = arith.constant 0 : index
    %c0_12 = arith.constant 0 : index
    %26 = vector.load %arg1[%c2, %c0_11, %c0_12] : memref<9x64x128xbf16, #tpu.memory_space<vmem>>, vector<1x64x128xbf16>
    %27 = vector.shape_cast %26 : vector<1x64x128xbf16> to vector<64x128xbf16>
    %cst_13 = arith.constant dense<0.000000e+00> : vector<32x128xf32>
    %28 = tpu.matmul %25, %27, %cst_13 {dimension_numbers = #tpu.dot_dimension_numbers<[1], [0], [0], [1], [0, 0, 1, 1], [], []>} : vector<32x64xbf16>, vector<64x128xbf16>, vector<32x128xf32> -> vector<32x128xf32>
    %29 = arith.addf %22, %28 : vector<32x128xf32>
    %30 = vector.extract_strided_slice %7 {offsets = [0, 1, 0], sizes = [2, 16, 64], strides = [1, 1, 1]} : vector<2x18x72xf32> to vector<2x16x64xf32>
    %31 = vector.shape_cast %30 : vector<2x16x64xf32> to vector<32x64xf32>
    %32 = arith.truncf %31 : vector<32x64xf32> to vector<32x64xbf16>
    %c3 = arith.constant 3 : index
    %c0_14 = arith.constant 0 : index
    %c0_15 = arith.constant 0 : index
    %33 = vector.load %arg1[%c3, %c0_14, %c0_15] : memref<9x64x128xbf16, #tpu.memory_space<vmem>>, vector<1x64x128xbf16>
    %34 = vector.shape_cast %33 : vector<1x64x128xbf16> to vector<64x128xbf16>
    %cst_16 = arith.constant dense<0.000000e+00> : vector<32x128xf32>
    %35 = tpu.matmul %32, %34, %cst_16 {dimension_numbers = #tpu.dot_dimension_numbers<[1], [0], [0], [1], [0, 0, 1, 1], [], []>} : vector<32x64xbf16>, vector<64x128xbf16>, vector<32x128xf32> -> vector<32x128xf32>
    %36 = arith.addf %29, %35 : vector<32x128xf32>
    %37 = vector.extract_strided_slice %7 {offsets = [0, 1, 4], sizes = [2, 16, 64], strides = [1, 1, 1]} : vector<2x18x72xf32> to vector<2x16x64xf32>
    %38 = vector.shape_cast %37 : vector<2x16x64xf32> to vector<32x64xf32>
    %39 = arith.truncf %38 : vector<32x64xf32> to vector<32x64xbf16>
    %c4 = arith.constant 4 : index
    %c0_17 = arith.constant 0 : index
    %c0_18 = arith.constant 0 : index
    %40 = vector.load %arg1[%c4, %c0_17, %c0_18] : memref<9x64x128xbf16, #tpu.memory_space<vmem>>, vector<1x64x128xbf16>
    %41 = vector.shape_cast %40 : vector<1x64x128xbf16> to vector<64x128xbf16>
    %cst_19 = arith.constant dense<0.000000e+00> : vector<32x128xf32>
    %42 = tpu.matmul %39, %41, %cst_19 {dimension_numbers = #tpu.dot_dimension_numbers<[1], [0], [0], [1], [0, 0, 1, 1], [], []>} : vector<32x64xbf16>, vector<64x128xbf16>, vector<32x128xf32> -> vector<32x128xf32>
    %43 = arith.addf %36, %42 : vector<32x128xf32>
    %44 = vector.extract_strided_slice %7 {offsets = [0, 1, 8], sizes = [2, 16, 64], strides = [1, 1, 1]} : vector<2x18x72xf32> to vector<2x16x64xf32>
    %45 = vector.shape_cast %44 : vector<2x16x64xf32> to vector<32x64xf32>
    %46 = arith.truncf %45 : vector<32x64xf32> to vector<32x64xbf16>
    %c5 = arith.constant 5 : index
    %c0_20 = arith.constant 0 : index
    %c0_21 = arith.constant 0 : index
    %47 = vector.load %arg1[%c5, %c0_20, %c0_21] : memref<9x64x128xbf16, #tpu.memory_space<vmem>>, vector<1x64x128xbf16>
    %48 = vector.shape_cast %47 : vector<1x64x128xbf16> to vector<64x128xbf16>
    %cst_22 = arith.constant dense<0.000000e+00> : vector<32x128xf32>
    %49 = tpu.matmul %46, %48, %cst_22 {dimension_numbers = #tpu.dot_dimension_numbers<[1], [0], [0], [1], [0, 0, 1, 1], [], []>} : vector<32x64xbf16>, vector<64x128xbf16>, vector<32x128xf32> -> vector<32x128xf32>
    %50 = arith.addf %43, %49 : vector<32x128xf32>
    %51 = vector.extract_strided_slice %7 {offsets = [0, 2, 0], sizes = [2, 16, 64], strides = [1, 1, 1]} : vector<2x18x72xf32> to vector<2x16x64xf32>
    %52 = vector.shape_cast %51 : vector<2x16x64xf32> to vector<32x64xf32>
    %53 = arith.truncf %52 : vector<32x64xf32> to vector<32x64xbf16>
    %c6 = arith.constant 6 : index
    %c0_23 = arith.constant 0 : index
    %c0_24 = arith.constant 0 : index
    %54 = vector.load %arg1[%c6, %c0_23, %c0_24] : memref<9x64x128xbf16, #tpu.memory_space<vmem>>, vector<1x64x128xbf16>
    %55 = vector.shape_cast %54 : vector<1x64x128xbf16> to vector<64x128xbf16>
    %cst_25 = arith.constant dense<0.000000e+00> : vector<32x128xf32>
    %56 = tpu.matmul %53, %55, %cst_25 {dimension_numbers = #tpu.dot_dimension_numbers<[1], [0], [0], [1], [0, 0, 1, 1], [], []>} : vector<32x64xbf16>, vector<64x128xbf16>, vector<32x128xf32> -> vector<32x128xf32>
    %57 = arith.addf %50, %56 : vector<32x128xf32>
    %58 = vector.extract_strided_slice %7 {offsets = [0, 2, 4], sizes = [2, 16, 64], strides = [1, 1, 1]} : vector<2x18x72xf32> to vector<2x16x64xf32>
    %59 = vector.shape_cast %58 : vector<2x16x64xf32> to vector<32x64xf32>
    %60 = arith.truncf %59 : vector<32x64xf32> to vector<32x64xbf16>
    %c7 = arith.constant 7 : index
    %c0_26 = arith.constant 0 : index
    %c0_27 = arith.constant 0 : index
    %61 = vector.load %arg1[%c7, %c0_26, %c0_27] : memref<9x64x128xbf16, #tpu.memory_space<vmem>>, vector<1x64x128xbf16>
    %62 = vector.shape_cast %61 : vector<1x64x128xbf16> to vector<64x128xbf16>
    %cst_28 = arith.constant dense<0.000000e+00> : vector<32x128xf32>
    %63 = tpu.matmul %60, %62, %cst_28 {dimension_numbers = #tpu.dot_dimension_numbers<[1], [0], [0], [1], [0, 0, 1, 1], [], []>} : vector<32x64xbf16>, vector<64x128xbf16>, vector<32x128xf32> -> vector<32x128xf32>
    %64 = arith.addf %57, %63 : vector<32x128xf32>
    %65 = vector.extract_strided_slice %7 {offsets = [0, 2, 8], sizes = [2, 16, 64], strides = [1, 1, 1]} : vector<2x18x72xf32> to vector<2x16x64xf32>
    %66 = vector.shape_cast %65 : vector<2x16x64xf32> to vector<32x64xf32>
    %67 = arith.truncf %66 : vector<32x64xf32> to vector<32x64xbf16>
    %c8 = arith.constant 8 : index
    %c0_29 = arith.constant 0 : index
    %c0_30 = arith.constant 0 : index
    %68 = vector.load %arg1[%c8, %c0_29, %c0_30] : memref<9x64x128xbf16, #tpu.memory_space<vmem>>, vector<1x64x128xbf16>
    %69 = vector.shape_cast %68 : vector<1x64x128xbf16> to vector<64x128xbf16>
    %cst_31 = arith.constant dense<0.000000e+00> : vector<32x128xf32>
    %70 = tpu.matmul %67, %69, %cst_31 {dimension_numbers = #tpu.dot_dimension_numbers<[1], [0], [0], [1], [0, 0, 1, 1], [], []>} : vector<32x64xbf16>, vector<64x128xbf16>, vector<32x128xf32> -> vector<32x128xf32>
    %71 = arith.addf %64, %70 : vector<32x128xf32>
    %72 = vector.broadcast %1 : vector<1x128xf32> to vector<32x128xf32>
    %73 = arith.addf %71, %72 : vector<32x128xf32>
    %cst_32 = arith.constant dense<0.000000e+00> : vector<128xf32>
    %74 = vector.multi_reduction <add>, %73, %cst_32 [0] : vector<32x128xf32> to vector<128xf32>
    %75 = vector.shape_cast %74 : vector<128xf32> to vector<1x128xf32>
    %c8_i32 = arith.constant 8 : i32
    %76 = tpu.dynamic_rotate %75 by %c8_i32 dim 1 : vector<1x128xf32>, i32 -> vector<1x128xf32>
    %77 = arith.addf %75, %76 : vector<1x128xf32>
    %c16_i32 = arith.constant 16 : i32
    %78 = tpu.dynamic_rotate %77 by %c16_i32 dim 1 : vector<1x128xf32>, i32 -> vector<1x128xf32>
    %79 = arith.addf %77, %78 : vector<1x128xf32>
    %c32_i32 = arith.constant 32 : i32
    %80 = tpu.dynamic_rotate %79 by %c32_i32 dim 1 : vector<1x128xf32>, i32 -> vector<1x128xf32>
    %81 = arith.addf %79, %80 : vector<1x128xf32>
    %c64_i32 = arith.constant 64 : i32
    %82 = tpu.dynamic_rotate %81 by %c64_i32 dim 1 : vector<1x128xf32>, i32 -> vector<1x128xf32>
    %83 = arith.addf %81, %82 : vector<1x128xf32>
    %cst_33 = arith.constant 0.001953125 : f32
    %84 = vector.broadcast %cst_33 : f32 to vector<1x128xf32>
    %85 = arith.mulf %83, %84 : vector<1x128xf32>
    %86 = vector.broadcast %85 : vector<1x128xf32> to vector<32x128xf32>
    %87 = arith.subf %73, %86 : vector<32x128xf32>
    %88 = arith.mulf %87, %87 : vector<32x128xf32>
    %cst_34 = arith.constant dense<0.000000e+00> : vector<128xf32>
    %89 = vector.multi_reduction <add>, %88, %cst_34 [0] : vector<32x128xf32> to vector<128xf32>
    %90 = vector.shape_cast %89 : vector<128xf32> to vector<1x128xf32>
    %c8_i32_35 = arith.constant 8 : i32
    %91 = tpu.dynamic_rotate %90 by %c8_i32_35 dim 1 : vector<1x128xf32>, i32 -> vector<1x128xf32>
    %92 = arith.addf %90, %91 : vector<1x128xf32>
    %c16_i32_36 = arith.constant 16 : i32
    %93 = tpu.dynamic_rotate %92 by %c16_i32_36 dim 1 : vector<1x128xf32>, i32 -> vector<1x128xf32>
    %94 = arith.addf %92, %93 : vector<1x128xf32>
    %c32_i32_37 = arith.constant 32 : i32
    %95 = tpu.dynamic_rotate %94 by %c32_i32_37 dim 1 : vector<1x128xf32>, i32 -> vector<1x128xf32>
    %96 = arith.addf %94, %95 : vector<1x128xf32>
    %c64_i32_38 = arith.constant 64 : i32
    %97 = tpu.dynamic_rotate %96 by %c64_i32_38 dim 1 : vector<1x128xf32>, i32 -> vector<1x128xf32>
    %98 = arith.addf %96, %97 : vector<1x128xf32>
    %cst_39 = arith.constant 0.001953125 : f32
    %99 = vector.broadcast %cst_39 : f32 to vector<1x128xf32>
    %100 = arith.mulf %98, %99 : vector<1x128xf32>
    %cst_40 = arith.constant 9.99999974E-6 : f32
    %101 = vector.broadcast %cst_40 : f32 to vector<1x128xf32>
    %102 = arith.addf %100, %101 : vector<1x128xf32>
    %103 = math.rsqrt %102 : vector<1x128xf32>
    %104 = arith.mulf %103, %2 : vector<1x128xf32>
    %105 = vector.broadcast %104 : vector<1x128xf32> to vector<32x128xf32>
    %106 = arith.mulf %87, %105 : vector<32x128xf32>
    %107 = vector.broadcast %3 : vector<1x128xf32> to vector<32x128xf32>
    %108 = arith.addf %106, %107 : vector<32x128xf32>
    %cst_41 = arith.constant 0.000000e+00 : f32
    %109 = vector.broadcast %cst_41 : f32 to vector<32x128xf32>
    %110 = arith.maximumf %108, %109 : vector<32x128xf32>
    %cst_42 = arith.constant 0.000000e+00 : f32
    %111 = vector.broadcast %cst_42 : f32 to vector<2x18x144xf32>
    %c0_43 = arith.constant 0 : index
    %c0_44 = arith.constant 0 : index
    %c0_45 = arith.constant 0 : index
    %112 = vector.load %arg5[%c0_43, %c0_44, %c0_45] : memref<2x18x144xf32, #tpu.memory_space<vmem>>, vector<2x18x144xf32>
    tpu.vector_store %arg5[%c0_43, %c0_44, %c0_45], %111 {strides = array<i32>} : memref<2x18x144xf32, #tpu.memory_space<vmem>>, vector<2x18x144xf32>,
    %113 = vector.shape_cast %110 : vector<32x128xf32> to vector<2x16x128xf32>
    %c0_46 = arith.constant 0 : index
    %c1_47 = arith.constant 1 : index
    %c8_48 = arith.constant 8 : index
    %114 = vector.load %arg5[%c0_46, %c1_47, %c8_48] : memref<2x18x144xf32, #tpu.memory_space<vmem>>, vector<2x16x128xf32>
    tpu.vector_store %arg5[%c0_46, %c1_47, %c8_48], %113 {strides = array<i32>} : memref<2x18x144xf32, #tpu.memory_space<vmem>>, vector<2x16x128xf32>,
    %c0_49 = arith.constant 0 : index
    %c0_50 = arith.constant 0 : index
    %c0_51 = arith.constant 0 : index
    %115 = vector.load %arg5[%c0_49, %c0_50, %c0_51] : memref<2x18x144xf32, #tpu.memory_space<vmem>>, vector<2x18x144xf32>
    %cst_52 = arith.constant 0.000000e+00 : f32
    %116 = vector.broadcast %cst_52 : f32 to vector<32x128xf32>
    %117 = vector.extract_strided_slice %115 {offsets = [0, 0, 0], sizes = [2, 16, 128], strides = [1, 1, 1]} : vector<2x18x144xf32> to vector<2x16x128xf32>
    %118 = vector.shape_cast %117 : vector<2x16x128xf32> to vector<32x128xf32>
    %119 = arith.truncf %118 : vector<32x128xf32> to vector<32x128xbf16>
    %c0_53 = arith.constant 0 : index
    %c0_54 = arith.constant 0 : index
    %c0_55 = arith.constant 0 : index
    %120 = vector.load %arg2[%c0_53, %c0_54, %c0_55] : memref<9x128x128xbf16, #tpu.memory_space<vmem>>, vector<1x128x128xbf16>
    %121 = vector.shape_cast %120 : vector<1x128x128xbf16> to vector<128x128xbf16>
    %cst_56 = arith.constant dense<0.000000e+00> : vector<32x128xf32>
    %122 = tpu.matmul %119, %121, %cst_56 {dimension_numbers = #tpu.dot_dimension_numbers<[1], [0], [0], [1], [0, 0, 1, 1], [], []>} : vector<32x128xbf16>, vector<128x128xbf16>, vector<32x128xf32> -> vector<32x128xf32>
    %123 = arith.addf %116, %122 : vector<32x128xf32>
    %124 = vector.extract_strided_slice %115 {offsets = [0, 0, 8], sizes = [2, 16, 128], strides = [1, 1, 1]} : vector<2x18x144xf32> to vector<2x16x128xf32>
    %125 = vector.shape_cast %124 : vector<2x16x128xf32> to vector<32x128xf32>
    %126 = arith.truncf %125 : vector<32x128xf32> to vector<32x128xbf16>
    %c1_57 = arith.constant 1 : index
    %c0_58 = arith.constant 0 : index
    %c0_59 = arith.constant 0 : index
    %127 = vector.load %arg2[%c1_57, %c0_58, %c0_59] : memref<9x128x128xbf16, #tpu.memory_space<vmem>>, vector<1x128x128xbf16>
    %128 = vector.shape_cast %127 : vector<1x128x128xbf16> to vector<128x128xbf16>
    %cst_60 = arith.constant dense<0.000000e+00> : vector<32x128xf32>
    %129 = tpu.matmul %126, %128, %cst_60 {dimension_numbers = #tpu.dot_dimension_numbers<[1], [0], [0], [1], [0, 0, 1, 1], [], []>} : vector<32x128xbf16>, vector<128x128xbf16>, vector<32x128xf32> -> vector<32x128xf32>
    %130 = arith.addf %123, %129 : vector<32x128xf32>
    %131 = vector.extract_strided_slice %115 {offsets = [0, 0, 16], sizes = [2, 16, 128], strides = [1, 1, 1]} : vector<2x18x144xf32> to vector<2x16x128xf32>
    %132 = vector.shape_cast %131 : vector<2x16x128xf32> to vector<32x128xf32>
    %133 = arith.truncf %132 : vector<32x128xf32> to vector<32x128xbf16>
    %c2_61 = arith.constant 2 : index
    %c0_62 = arith.constant 0 : index
    %c0_63 = arith.constant 0 : index
    %134 = vector.load %arg2[%c2_61, %c0_62, %c0_63] : memref<9x128x128xbf16, #tpu.memory_space<vmem>>, vector<1x128x128xbf16>
    %135 = vector.shape_cast %134 : vector<1x128x128xbf16> to vector<128x128xbf16>
    %cst_64 = arith.constant dense<0.000000e+00> : vector<32x128xf32>
    %136 = tpu.matmul %133, %135, %cst_64 {dimension_numbers = #tpu.dot_dimension_numbers<[1], [0], [0], [1], [0, 0, 1, 1], [], []>} : vector<32x128xbf16>, vector<128x128xbf16>, vector<32x128xf32> -> vector<32x128xf32>
    %137 = arith.addf %130, %136 : vector<32x128xf32>
    %138 = vector.extract_strided_slice %115 {offsets = [0, 1, 0], sizes = [2, 16, 128], strides = [1, 1, 1]} : vector<2x18x144xf32> to vector<2x16x128xf32>
    %139 = vector.shape_cast %138 : vector<2x16x128xf32> to vector<32x128xf32>
    %140 = arith.truncf %139 : vector<32x128xf32> to vector<32x128xbf16>
    %c3_65 = arith.constant 3 : index
    %c0_66 = arith.constant 0 : index
    %c0_67 = arith.constant 0 : index
    %141 = vector.load %arg2[%c3_65, %c0_66, %c0_67] : memref<9x128x128xbf16, #tpu.memory_space<vmem>>, vector<1x128x128xbf16>
    %142 = vector.shape_cast %141 : vector<1x128x128xbf16> to vector<128x128xbf16>
    %cst_68 = arith.constant dense<0.000000e+00> : vector<32x128xf32>
    %143 = tpu.matmul %140, %142, %cst_68 {dimension_numbers = #tpu.dot_dimension_numbers<[1], [0], [0], [1], [0, 0, 1, 1], [], []>} : vector<32x128xbf16>, vector<128x128xbf16>, vector<32x128xf32> -> vector<32x128xf32>
    %144 = arith.addf %137, %143 : vector<32x128xf32>
    %145 = vector.extract_strided_slice %115 {offsets = [0, 1, 8], sizes = [2, 16, 128], strides = [1, 1, 1]} : vector<2x18x144xf32> to vector<2x16x128xf32>
    %146 = vector.shape_cast %145 : vector<2x16x128xf32> to vector<32x128xf32>
    %147 = arith.truncf %146 : vector<32x128xf32> to vector<32x128xbf16>
    %c4_69 = arith.constant 4 : index
    %c0_70 = arith.constant 0 : index
    %c0_71 = arith.constant 0 : index
    %148 = vector.load %arg2[%c4_69, %c0_70, %c0_71] : memref<9x128x128xbf16, #tpu.memory_space<vmem>>, vector<1x128x128xbf16>
    %149 = vector.shape_cast %148 : vector<1x128x128xbf16> to vector<128x128xbf16>
    %cst_72 = arith.constant dense<0.000000e+00> : vector<32x128xf32>
    %150 = tpu.matmul %147, %149, %cst_72 {dimension_numbers = #tpu.dot_dimension_numbers<[1], [0], [0], [1], [0, 0, 1, 1], [], []>} : vector<32x128xbf16>, vector<128x128xbf16>, vector<32x128xf32> -> vector<32x128xf32>
    %151 = arith.addf %144, %150 : vector<32x128xf32>
    %152 = vector.extract_strided_slice %115 {offsets = [0, 1, 16], sizes = [2, 16, 128], strides = [1, 1, 1]} : vector<2x18x144xf32> to vector<2x16x128xf32>
    %153 = vector.shape_cast %152 : vector<2x16x128xf32> to vector<32x128xf32>
    %154 = arith.truncf %153 : vector<32x128xf32> to vector<32x128xbf16>
    %c5_73 = arith.constant 5 : index
    %c0_74 = arith.constant 0 : index
    %c0_75 = arith.constant 0 : index
    %155 = vector.load %arg2[%c5_73, %c0_74, %c0_75] : memref<9x128x128xbf16, #tpu.memory_space<vmem>>, vector<1x128x128xbf16>
    %156 = vector.shape_cast %155 : vector<1x128x128xbf16> to vector<128x128xbf16>
    %cst_76 = arith.constant dense<0.000000e+00> : vector<32x128xf32>
    %157 = tpu.matmul %154, %156, %cst_76 {dimension_numbers = #tpu.dot_dimension_numbers<[1], [0], [0], [1], [0, 0, 1, 1], [], []>} : vector<32x128xbf16>, vector<128x128xbf16>, vector<32x128xf32> -> vector<32x128xf32>
    %158 = arith.addf %151, %157 : vector<32x128xf32>
    %159 = vector.extract_strided_slice %115 {offsets = [0, 2, 0], sizes = [2, 16, 128], strides = [1, 1, 1]} : vector<2x18x144xf32> to vector<2x16x128xf32>
    %160 = vector.shape_cast %159 : vector<2x16x128xf32> to vector<32x128xf32>
    %161 = arith.truncf %160 : vector<32x128xf32> to vector<32x128xbf16>
    %c6_77 = arith.constant 6 : index
    %c0_78 = arith.constant 0 : index
    %c0_79 = arith.constant 0 : index
    %162 = vector.load %arg2[%c6_77, %c0_78, %c0_79] : memref<9x128x128xbf16, #tpu.memory_space<vmem>>, vector<1x128x128xbf16>
    %163 = vector.shape_cast %162 : vector<1x128x128xbf16> to vector<128x128xbf16>
    %cst_80 = arith.constant dense<0.000000e+00> : vector<32x128xf32>
    %164 = tpu.matmul %161, %163, %cst_80 {dimension_numbers = #tpu.dot_dimension_numbers<[1], [0], [0], [1], [0, 0, 1, 1], [], []>} : vector<32x128xbf16>, vector<128x128xbf16>, vector<32x128xf32> -> vector<32x128xf32>
    %165 = arith.addf %158, %164 : vector<32x128xf32>
    %166 = vector.extract_strided_slice %115 {offsets = [0, 2, 8], sizes = [2, 16, 128], strides = [1, 1, 1]} : vector<2x18x144xf32> to vector<2x16x128xf32>
    %167 = vector.shape_cast %166 : vector<2x16x128xf32> to vector<32x128xf32>
    %168 = arith.truncf %167 : vector<32x128xf32> to vector<32x128xbf16>
    %c7_81 = arith.constant 7 : index
    %c0_82 = arith.constant 0 : index
    %c0_83 = arith.constant 0 : index
    %169 = vector.load %arg2[%c7_81, %c0_82, %c0_83] : memref<9x128x128xbf16, #tpu.memory_space<vmem>>, vector<1x128x128xbf16>
    %170 = vector.shape_cast %169 : vector<1x128x128xbf16> to vector<128x128xbf16>
    %cst_84 = arith.constant dense<0.000000e+00> : vector<32x128xf32>
    %171 = tpu.matmul %168, %170, %cst_84 {dimension_numbers = #tpu.dot_dimension_numbers<[1], [0], [0], [1], [0, 0, 1, 1], [], []>} : vector<32x128xbf16>, vector<128x128xbf16>, vector<32x128xf32> -> vector<32x128xf32>
    %172 = arith.addf %165, %171 : vector<32x128xf32>
    %173 = vector.extract_strided_slice %115 {offsets = [0, 2, 16], sizes = [2, 16, 128], strides = [1, 1, 1]} : vector<2x18x144xf32> to vector<2x16x128xf32>
    %174 = vector.shape_cast %173 : vector<2x16x128xf32> to vector<32x128xf32>
    %175 = arith.truncf %174 : vector<32x128xf32> to vector<32x128xbf16>
    %c8_85 = arith.constant 8 : index
    %c0_86 = arith.constant 0 : index
    %c0_87 = arith.constant 0 : index
    %176 = vector.load %arg2[%c8_85, %c0_86, %c0_87] : memref<9x128x128xbf16, #tpu.memory_space<vmem>>, vector<1x128x128xbf16>
    %177 = vector.shape_cast %176 : vector<1x128x128xbf16> to vector<128x128xbf16>
    %cst_88 = arith.constant dense<0.000000e+00> : vector<32x128xf32>
    %178 = tpu.matmul %175, %177, %cst_88 {dimension_numbers = #tpu.dot_dimension_numbers<[1], [0], [0], [1], [0, 0, 1, 1], [], []>} : vector<32x128xbf16>, vector<128x128xbf16>, vector<32x128xf32> -> vector<32x128xf32>
    %179 = arith.addf %172, %178 : vector<32x128xf32>
    %180 = vector.broadcast %4 : vector<1x128xf32> to vector<32x128xf32>
    %181 = arith.addf %179, %180 : vector<32x128xf32>
    %cst_89 = arith.constant dense<0.000000e+00> : vector<128xf32>
    %182 = vector.multi_reduction <add>, %181, %cst_89 [0] : vector<32x128xf32> to vector<128xf32>
    %183 = vector.shape_cast %182 : vector<128xf32> to vector<1x128xf32>
    %c8_i32_90 = arith.constant 8 : i32
    %184 = tpu.dynamic_rotate %183 by %c8_i32_90 dim 1 : vector<1x128xf32>, i32 -> vector<1x128xf32>
    %185 = arith.addf %183, %184 : vector<1x128xf32>
    %c16_i32_91 = arith.constant 16 : i32
    %186 = tpu.dynamic_rotate %185 by %c16_i32_91 dim 1 : vector<1x128xf32>, i32 -> vector<1x128xf32>
    %187 = arith.addf %185, %186 : vector<1x128xf32>
    %c32_i32_92 = arith.constant 32 : i32
    %188 = tpu.dynamic_rotate %187 by %c32_i32_92 dim 1 : vector<1x128xf32>, i32 -> vector<1x128xf32>
    %189 = arith.addf %187, %188 : vector<1x128xf32>
    %c64_i32_93 = arith.constant 64 : i32
    %190 = tpu.dynamic_rotate %189 by %c64_i32_93 dim 1 : vector<1x128xf32>, i32 -> vector<1x128xf32>
    %191 = arith.addf %189, %190 : vector<1x128xf32>
    %cst_94 = arith.constant 0.001953125 : f32
    %192 = vector.broadcast %cst_94 : f32 to vector<1x128xf32>
    %193 = arith.mulf %191, %192 : vector<1x128xf32>
    %194 = vector.broadcast %193 : vector<1x128xf32> to vector<32x128xf32>
    %195 = arith.subf %181, %194 : vector<32x128xf32>
    %196 = arith.mulf %195, %195 : vector<32x128xf32>
    %cst_95 = arith.constant dense<0.000000e+00> : vector<128xf32>
    %197 = vector.multi_reduction <add>, %196, %cst_95 [0] : vector<32x128xf32> to vector<128xf32>
    %198 = vector.shape_cast %197 : vector<128xf32> to vector<1x128xf32>
    %c8_i32_96 = arith.constant 8 : i32
    %199 = tpu.dynamic_rotate %198 by %c8_i32_96 dim 1 : vector<1x128xf32>, i32 -> vector<1x128xf32>
    %200 = arith.addf %198, %199 : vector<1x128xf32>
    %c16_i32_97 = arith.constant 16 : i32
    %201 = tpu.dynamic_rotate %200 by %c16_i32_97 dim 1 : vector<1x128xf32>, i32 -> vector<1x128xf32>
    %202 = arith.addf %200, %201 : vector<1x128xf32>
    %c32_i32_98 = arith.constant 32 : i32
    %203 = tpu.dynamic_rotate %202 by %c32_i32_98 dim 1 : vector<1x128xf32>, i32 -> vector<1x128xf32>
    %204 = arith.addf %202, %203 : vector<1x128xf32>
    %c64_i32_99 = arith.constant 64 : i32
    %205 = tpu.dynamic_rotate %204 by %c64_i32_99 dim 1 : vector<1x128xf32>, i32 -> vector<1x128xf32>
    %206 = arith.addf %204, %205 : vector<1x128xf32>
    %cst_100 = arith.constant 0.001953125 : f32
    %207 = vector.broadcast %cst_100 : f32 to vector<1x128xf32>
    %208 = arith.mulf %206, %207 : vector<1x128xf32>
    %cst_101 = arith.constant 9.99999974E-6 : f32
    %209 = vector.broadcast %cst_101 : f32 to vector<1x128xf32>
    %210 = arith.addf %208, %209 : vector<1x128xf32>
    %211 = math.rsqrt %210 : vector<1x128xf32>
    %212 = arith.mulf %211, %5 : vector<1x128xf32>
    %213 = vector.broadcast %212 : vector<1x128xf32> to vector<32x128xf32>
    %214 = arith.mulf %195, %213 : vector<32x128xf32>
    %215 = vector.broadcast %6 : vector<1x128xf32> to vector<32x128xf32>
    %216 = arith.addf %214, %215 : vector<32x128xf32>
    %c0_102 = arith.constant 0 : index
    %c0_103 = arith.constant 0 : index
    %217 = vector.load %arg4[%c0_102, %c0_103] : memref<32x128xf32, #tpu.memory_space<vmem>>, vector<32x128xf32>
    tpu.vector_store %arg4[%c0_102, %c0_103], %216 {strides = array<i32>} : memref<32x128xf32, #tpu.memory_space<vmem>>, vector<32x128xf32>,
    return
  }
}

</mosaic_0001>

<bundles_post_ra>
// kernel: block_type4_forward.1
= control target key start
LH: loop header
LB: loop body
LE: loop exit
PB: predicated region body
PF: predicated region fallthrough
CT: control target
= control target key end

     0   :  { %9 = vsyncpa [#allocation4], 0  ;;  %s3238_s15 = smov [#allocation3]   ;;  %s3779_s0 = inlined_call_operand.vmem [shape: f32[2,18,72], index: 0, kind: input, shape index: {}]   ;;  %s3780_s1 = inlined_call_operand.hbm [shape: bf16[9,64,128], index: 1, kind: input, shape index: {}]   ;;  %s3781_s2 = inlined_call_operand.vmem [shape: bf16[9,128,128], index: 2, kind: input, shape index: {}]   ;;  %s3782_s3 = inlined_call_operand.vmem [shape: f32[6,128], index: 3, kind: input, shape index: {}]   ;;  %s3783_s4 = inlined_call_operand.vmem [shape: f32[32,128], index: 4, kind: output, shape index: {}]  }
   0x1   :  { %s17_s16 = sshll.u32 %s3238_s15, 4  ;;  %s18_s16 = int_to_ptr.vmem [resolvable:$true] %s17_s16 }
   0x2   :  { %s3224_s17 = scalar_lea.vmem %s18_s16, 4608  ;;  %p3229_p1 = scmp.lt.s32.totalorder %s18_s16, %s18_s16 }
   0x3   :  { %p3225_p0 = scmp.ne.s32.totalorder %s18_s16, %s3224_s17  ;;  %p3230_p2 = scmp.lt.s32.totalorder %s3224_s17, %s3224_s17 }
   0x5   :  { %p3231_p3 = por %p3230_p2, %p3229_p1 }
   0x7   :  { %p3232_p4 = pnand %p3231_p3, %p3225_p0 }
   0x9   :  { %3235 = shalt.err (!%p3232_p4)
}
   0xa   :  { %s3239_s18 = smov 64   ;;  %s3240_s19 = smov 4  }
   0xb   :  { %23 = dma.hbm_to_vmem [thread:$0]  %s3780_s1, 4608, %s18_s16, [#allocation4], %s3239_s18, %s3239_s18, %s3240_s19  }
   0xc   :  { %3236 = dma.done.wait [#allocation4], 4608  }
   0xd   :  { %3237 = vsyncadd [#allocation4], 4294962688  ;;  %v33_v0 = vld [vmem:[%s3779_s0] sm:$0xff]  ;;  %v34_v1 = vld [vmem:[%s3779_s0 + $0x8] sm:$0xff]  ;;  %vm325_vm0 = vcmask 1046528   ;;  %vm88_vm1 = vcmask 523264  }
   0xe   :  { %v36_v2 = vld [vmem:[%s3779_s0 + $0x18] sm:$0xff]  ;;  %v39_v3 = vpack.c.bf16 %v34_v1, %v33_v0  ;;  %v326_v4 = vrot.slane %v33_v0, 1  ;;  %v327_v5 = vrot.slane %v34_v1, 1  ;;  %v37_v6 = vld [vmem:[%s3779_s0 + $0x20] sm:$0xff]  ;;  %v35_v7 = vld [vmem:[%s3779_s0 + $0x10] sm:$0x3] }
   0xf   :  { %v331_v8 = vrot.slane %v36_v2, 1  ;;  %v332_v9 = vrot.slane %v37_v6, 1  ;;  %v38_v10 = vld [vmem:[%s3779_s0 + $0x28] sm:$0x3]  ;;  %v3103_v11 = vld [vmem:[#allocation3 + $0x38] sm:$0xff]   ;;  %v629_v12 = vrot.slane %v33_v0, 2  ;;  %v40_v14 = vpack.c.bf16 %v37_v6, %v36_v2 }
  0x10   :  { %v630_v13 = vrot.slane %v34_v1, 2  ;;  %s3241_s7 = smov 124   ;;  %s3242_s8 = smov 120   ;;  %v329_v15 = vrot.slane %v35_v7, 1  ;;  %v3104_v16 = vld [vmem:[#allocation3 + $0x18] sm:$0xff]   ;;  %v634_v17 = vrot.slane %v36_v2, 2  ;;  %v328_v18 = vsel %vm325_vm0, %v326_v4, %v327_v5  ;;  %2805 = vmatprep.subr.bf16.mxu0 %v3103_v11  ;;  %2825 = vmatprep.mubr.msk.bf16.mxu1 %vm88_vm1, %v39_v3 }
  0x11   :  { %60 = vrot.lane.b32.xlu0 %v39_v3, %s3241_s7  ;;  %232 = vrot.lane.b32.xlu1 %v39_v3, %s3242_s8  ;;  %v333_v19 = vsel %vm325_vm0, %v331_v8, %v332_v9  ;;  %v334_v20 = vrot.slane %v38_v10, 1  ;;  %v635_v21 = vrot.slane %v37_v6, 2  ;;  %v3105_v23 = vld [vmem:[#allocation3 + $0x30] sm:$0xff]   ;;  %v632_v27 = vrot.slane %v35_v7, 2  ;;  %v3107_v30 = vld [vmem:[#allocation3 + $0x28] sm:$0xff]   ;;  %v3109_v32 = vld [vmem:[#allocation3 + $0x20] sm:$0xff]  }
  0x12   :  { %v330_v22 = vsel %vm325_vm0, %v327_v5, %v329_v15  ;;  %2806 = vmatpush3.bf16.msra.mxu0 %v3103_v11  ;;  %2817 = vmatprep.subr.bf16.mxu1 %v3104_v16  ;;  %v3106_v28 = vld [vmem:[#allocation3 + $0x10] sm:$0xff]   ;;  %v637_v29 = vrot.slane %v38_v10, 2  ;;  %vm628_vm2 = vcmask 1045504   ;;  %v3108_v31 = vld [vmem:[#allocation3 + $0x8] sm:$0xff]   ;;  %v3110_v37 = vld [vmem:[#allocation3] sm:$0xff]   ;;  %s3243_s10 = smov 8  }
  0x13   :  { %v335_v24 = vsel %vm325_vm0, %v332_v9, %v334_v20  ;;  %2818 = vmatpush3.bf16.msra.mxu1 %v3104_v16  ;;  %v340_v25 = vpack.c.bf16 %v330_v22, %v328_v18  ;;  %2807 = vmatprep.subr.bf16.mxu0 %v3105_v23  ;;  %v631_v33 = vsel %vm628_vm2, %v629_v12, %v630_v13  ;;  %v3111_v38 = vld [vmem:[#allocation3 + $0x58] sm:$0xff]   ;;  %v3114_v42 = vld [vmem:[#allocation3 + $0x70] sm:$0xff]   ;;  %v3116_v43 = vld [vmem:[#allocation3 + $0x68] sm:$0xff]   ;;  %s3244_s11 = smov 16   ;;  %s3245_s12 = smov 32   ;;  %vm1022_vm3 = vcmask 130048  }
  0x14   :  { %v341_v26 = vpack.c.bf16 %v335_v24, %v333_v19  ;;  %2819 = vmatprep.subr.bf16.mxu1 %v3106_v28  ;;  %v633_v34 = vsel %vm628_vm2, %v630_v13, %v632_v27  ;;  %v636_v35 = vsel %vm628_vm2, %v634_v17, %v635_v21  ;;  %v638_v36 = vsel %vm628_vm2, %v635_v21, %v637_v29  ;;  %v3112_v41 = vld [vmem:[#allocation3 + $0x78] sm:$0xff]   ;;  %v3118_v44 = vld [vmem:[#allocation3 + $0x60] sm:$0xff]   ;;  %v3122_v46 = vld [vmem:[#allocation3 + $0xb0] sm:$0xff]   ;;  %s3247_s30 = smov 112  }
  0x15   :  { %62 = vrot.lane.b32.xlu0 %v40_v14, %s3241_s7  ;;  %234 = vrot.lane.b32.xlu1 %v40_v14, %s3242_s8  ;;  %v3313_v39 = vpack.c.bf16 %v633_v34, %v631_v33  ;;  %v3315_v40 = vpack.c.bf16 %v638_v36, %v636_v35  ;;  %v3120_v45 = vld [vmem:[#allocation3 + $0xb8] sm:$0xff]   ;;  %v3124_v47 = vld [vmem:[#allocation3 + $0xa8] sm:$0xff]   ;;  %v3126_v48 = vld [vmem:[#allocation3 + $0xa0] sm:$0xff]   ;;  %vm1027_vm4 = vcmask 123904   ;;  %vm1039_vm5 = vcmask 1040384  }
  0x16   :  { %2808 = vmatpush3.bf16.msra.mxu0 %v3105_v23  ;;  %v3128_v49 = vld [vmem:[#allocation3 + $0xf8] sm:$0xff]   ;;  %v3113_v52 = vld [vmem:[#allocation3 + $0x50] sm:$0xff]   ;;  %v3115_v55 = vld [vmem:[#allocation3 + $0x48] sm:$0xff]   ;;  %vm1064_vm6 = vcmask 1047617   ;;  %vm1066_vm7 = vcmask 64513   ;;  %vm1068_vm8 = vcmask 1047616  }
  0x17   :  { %2820 = vmatpush3.bf16.msra.mxu1 %v3106_v28  ;;  %2809 = vmatprep.subr.bf16.mxu0 %v3107_v30  ;;  %v3117_v58 = vld [vmem:[#allocation3 + $0x40] sm:$0xff]   ;;  %v3130_v61 = vld [vmem:[#allocation3 + $0xf0] sm:$0xff]   ;;  %v3119_v62 = vld [vmem:[#allocation3 + $0x98] sm:$0xff]   ;;  %vm1070_vm9 = vcmask 64512   ;;  %vm1072_vm10 = vcmask 1040448   ;;  %vm1074_vm11 = vcmask 57344  }
  0x18   :  { %2821 = vmatprep.subr.bf16.mxu1 %v3108_v31  ;;  %v3132_v63 = vld [vmem:[#allocation3 + $0xe8] sm:$0xff]   ;;  %v3121_v1 = vld [vmem:[#allocation3 + $0x90] sm:$0xff]   ;;  %v3134_v2 = vld [vmem:[#allocation3 + $0xe0] sm:$0xff]   ;;  %vm1143_vm12 = vcmask 982016   ;;  %vm1367_vm13 = vcmask 916480  }
  0x19   :  { %445 = vrot.lane.b32.xlu0 %v340_v25, %s3241_s7  ;;  %447 = vrot.lane.b32.xlu1 %v341_v26, %s3241_s7  ;;  %v3123_v3 = vld [vmem:[#allocation3 + $0x88] sm:$0xff]   ;;  %v3125_v4 = vld [vmem:[#allocation3 + $0x80] sm:$0xff]   ;;  %v3127_v6 = vld [vmem:[#allocation3 + $0xd8] sm:$0xff]  }
  0x1a   :  { %2810 = vmatpush3.bf16.msra.mxu0 %v3107_v30  ;;  %v3129_v7 = vld [vmem:[#allocation3 + $0xd0] sm:$0xff]   ;;  %v3131_v8 = vld [vmem:[#allocation3 + $0xc8] sm:$0xff]   ;;  %v3133_v9 = vld [vmem:[#allocation3 + $0xc0] sm:$0xff]  }
  0x1b   :  { %2822 = vmatpush3.bf16.msra.mxu1 %v3108_v31  ;;  %2811 = vmatprep.subr.bf16.mxu0 %v3109_v32  ;;  %v3135_v10 = vld [vmem:[#allocation3 + $0x118] sm:$0xff]   ;;  %v3136_v11 = vld [vmem:[#allocation3 + $0x110] sm:$0xff]   ;;  %v3137_v13 = vld [vmem:[#allocation3 + $0x108] sm:$0xff]  }
  0x1c   :  { %2823 = vmatprep.subr.bf16.mxu1 %v3110_v37 }
  0x1d   :  { %541 = vrot.lane.b32.xlu0 %v340_v25, %s3242_s8  ;;  %543 = vrot.lane.b32.xlu1 %v341_v26, %s3242_s8 }
  0x1e   :  { %2812 = vmatpush3.bf16.msra.mxu0 %v3109_v32 }
  0x1f   :  { %2824 = vmatpush3.bf16.msra.mxu1 %v3110_v37  ;;  %2829 = vmatprep.subr.bf16.mxu0 %v3111_v38 }
  0x20   :  { %2841 = vmatprep.subr.bf16.mxu1 %v3112_v41 }
  0x21   :  { %748 = vrot.lane.b32.xlu0 %v3313_v39, %s3241_s7  ;;  %750 = vrot.lane.b32.xlu1 %v3315_v40, %s3241_s7 }
  0x22   :  { %2826 = vmatmul.mubr.msk.bf16.vlgmr.msra.gmra.mxu1 %vm88_vm1, %v40_v14  ;;  %v3138_v14 = vld [vmem:[#allocation3 + $0x100] sm:$0xff]  }
  0x23   :  { %2842 = vmatpush3.bf16.msra.mxu1 %v3112_v41  ;;  %2849 = vmatprep.mubr.msk.bf16.mxu1 %vm88_vm1, %v340_v25 }
  0x24   :  { %2843 = vmatprep.subr.bf16.mxu1 %v3114_v42 }
  0x25   :  { %844 = vrot.lane.b32.xlu0 %v3313_v39, %s3242_s8  ;;  %846 = vrot.lane.b32.xlu1 %v3315_v40, %s3242_s8 }
  0x27   :  { %2844 = vmatpush3.bf16.msra.mxu1 %v3114_v42 }
  0x28   :  { %2845 = vmatprep.subr.bf16.mxu1 %v3116_v43 }
  0x2b   :  { %2846 = vmatpush3.bf16.msra.mxu1 %v3116_v43 }
  0x2c   :  { %2847 = vmatprep.subr.bf16.mxu1 %v3118_v44 }
  0x2f   :  { %2848 = vmatpush3.bf16.msra.mxu1 %v3118_v44 }
  0x30   :  { %2865 = vmatprep.subr.bf16.mxu1 %v3120_v45 }
  0x32   :  { %2850 = vmatmul.mubr.msk.bf16.vlgmr.msra.gmra.mxu1 %vm88_vm1, %v341_v26 }
  0x33   :  { %2866 = vmatpush3.bf16.msra.mxu1 %v3120_v45 }
  0x34   :  { %2867 = vmatprep.subr.bf16.mxu1 %v3122_v46 }
  0x37   :  { %2868 = vmatpush3.bf16.msra.mxu1 %v3122_v46 }
  0x38   :  { %2869 = vmatprep.subr.bf16.mxu1 %v3124_v47 }
  0x3b   :  { %2870 = vmatpush3.bf16.msra.mxu1 %v3124_v47 }
  0x3c   :  { %2871 = vmatprep.subr.bf16.mxu1 %v3126_v48 }
  0x3f   :  { %2872 = vmatpush3.bf16.msra.mxu1 %v3126_v48 }
  0x40   :  { %2889 = vmatprep.subr.bf16.mxu1 %v3128_v49 }
  0x83   :  { %v61_v50 = vpop.permute.xlu0 %60  ;;  %v233_v51 = vpop.permute.xlu1 %232 }
  0x84   :  { %2813 = vmatprep.mubr.msk.bf16.mxu0 %vm88_vm1, %v61_v50 }
  0x87   :  { %v63_v53 = vpop.permute.xlu0 %62  ;;  %v235_v54 = vpop.permute.xlu1 %234 }
  0x88   :  { %2814 = vmatmul.mubr.msk.bf16.vlgmr.msra.gmra.mxu0 %vm88_vm1, %v63_v53 }
  0x89   :  { %2830 = vmatpush3.bf16.msra.mxu0 %v3111_v38  ;;  %2837 = vmatprep.mubr.msk.bf16.mxu0 %vm88_vm1, %v233_v51 }
  0x8a   :  { %2831 = vmatprep.subr.bf16.mxu0 %v3113_v52 }
  0x8b   :  { %v446_v56 = vpop.permute.xlu0 %445  ;;  %v448_v57 = vpop.permute.xlu1 %447 }
  0x8d   :  { %2832 = vmatpush3.bf16.msra.mxu0 %v3113_v52 }
  0x8e   :  { %2833 = vmatprep.subr.bf16.mxu0 %v3115_v55 }
  0x8f   :  { %v542_v59 = vpop.permute.xlu0 %541  ;;  %v544_v60 = vpop.permute.xlu1 %543 }
  0x90   :  { %2873 = vmatprep.mubr.msk.bf16.mxu1 %vm88_vm1, %v542_v59 }
  0x91   :  { %2834 = vmatpush3.bf16.msra.mxu0 %v3115_v55  ;;  %2874 = vmatmul.mubr.msk.bf16.vlgmr.msra.gmra.mxu1 %vm88_vm1, %v544_v60  ;;  %v931_v60 = vlaneseq }
  0x92   :  { %2835 = vmatprep.subr.bf16.mxu0 %v3117_v58  ;;  %2890 = vmatpush3.bf16.msra.mxu1 %v3128_v49 }
  0x93   :  { %2891 = vmatprep.subr.bf16.mxu1 %v3130_v61  ;;  %v749_v0 = vpop.permute.xlu0 %748  ;;  %v751_v5 = vpop.permute.xlu1 %750 }
  0x94   :  { %2897 = vmatprep.mubr.msk.bf16.mxu1 %vm88_vm1, %v749_v0 }
  0x95   :  { %2836 = vmatpush3.bf16.msra.mxu0 %v3117_v58 }
  0x96   :  { %2853 = vmatprep.subr.bf16.mxu0 %v3119_v62  ;;  %2892 = vmatpush3.bf16.msra.mxu1 %v3130_v61 }
  0x97   :  { %2893 = vmatprep.subr.bf16.mxu1 %v3132_v63  ;;  %v845_v12 = vpop.permute.xlu0 %844  ;;  %v847_v15 = vpop.permute.xlu1 %846 }
  0x98   :  { %2838 = vmatmul.mubr.msk.bf16.vlgmr.msra.gmra.mxu0 %vm88_vm1, %v235_v54 }
  0x99   :  { %2854 = vmatpush3.bf16.msra.mxu0 %v3119_v62  ;;  %2861 = vmatprep.mubr.msk.bf16.mxu0 %vm88_vm1, %v446_v56 }
  0x9a   :  { %2855 = vmatprep.subr.bf16.mxu0 %v3121_v1  ;;  %2894 = vmatpush3.bf16.msra.mxu1 %v3132_v63 }
  0x9b   :  { %2895 = vmatprep.subr.bf16.mxu1 %v3134_v2 }
  0x9d   :  { %2856 = vmatpush3.bf16.msra.mxu0 %v3121_v1 }
  0x9e   :  { %2857 = vmatprep.subr.bf16.mxu0 %v3123_v3  ;;  %2896 = vmatpush3.bf16.msra.mxu1 %v3134_v2 }
  0xa1   :  { %2858 = vmatpush3.bf16.msra.mxu0 %v3123_v3  ;;  %2898 = vmatmul.mubr.msk.bf16.vlgmr.msra.gmra.mxu1 %vm88_vm1, %v751_v5 }
  0xa2   :  { %2859 = vmatprep.subr.bf16.mxu0 %v3125_v4 }
  0xa5   :  { %2860 = vmatpush3.bf16.msra.mxu0 %v3125_v4  ;;  %v3344_v4 = vshrl.u32 %v931_v60, 7 }
  0xa6   :  { %2877 = vmatprep.subr.bf16.mxu0 %v3127_v6 }
  0xa8   :  { %2862 = vmatmul.mubr.msk.bf16.vlgmr.msra.gmra.mxu0 %vm88_vm1, %v448_v57 }
  0xa9   :  { %2878 = vmatpush3.bf16.msra.mxu0 %v3127_v6  ;;  %2885 = vmatprep.mubr.msk.bf16.mxu0 %vm88_vm1, %v3313_v39 }
  0xaa   :  { %2879 = vmatprep.subr.bf16.mxu0 %v3129_v7 }
  0xad   :  { %2880 = vmatpush3.bf16.msra.mxu0 %v3129_v7 }
  0xae   :  { %2881 = vmatprep.subr.bf16.mxu0 %v3131_v8 }
  0xb1   :  { %2882 = vmatpush3.bf16.msra.mxu0 %v3131_v8 }
  0xb2   :  { %2883 = vmatprep.subr.bf16.mxu0 %v3133_v9 }
  0xb5   :  { %2884 = vmatpush3.bf16.msra.mxu0 %v3133_v9 }
  0xb6   :  { %2901 = vmatprep.subr.bf16.mxu0 %v3135_v10 }
  0xb8   :  { %2886 = vmatmul.mubr.msk.bf16.vlgmr.msra.gmra.mxu0 %vm88_vm1, %v3315_v40 }
  0xb9   :  { %2902 = vmatpush3.bf16.msra.mxu0 %v3135_v10  ;;  %2909 = vmatprep.mubr.msk.bf16.mxu0 %vm88_vm1, %v845_v12 }
  0xba   :  { %2903 = vmatprep.subr.bf16.mxu0 %v3136_v11 }
  0xbd   :  { %2904 = vmatpush3.bf16.msra.mxu0 %v3136_v11 }
  0xbe   :  { %2905 = vmatprep.subr.bf16.mxu0 %v3137_v13 }
  0xc1   :  { %2906 = vmatpush3.bf16.msra.mxu0 %v3137_v13  ;;  %v3347_v13 = vsub.s32 0, %v3344_v4 }
  0xc2   :  { %2907 = vmatprep.subr.bf16.mxu0 %v3138_v14 }
  0xc5   :  { %2908 = vmatpush3.bf16.msra.mxu0 %v3138_v14  ;;  %v3352_v14 = vld [vmem:[%s3782_s3] sm:$0x3f] }
  0xc8   :  { %2910 = vmatmul.mubr.msk.bf16.vlgmr.msra.gmra.mxu0 %vm88_vm1, %v847_v15 }
  0xe2   :  { %v2827_v17 = vpop.f32.mrf.mxu1 }
  0xe4   :  { %v208_v19 = vpop.f32.mrf.mxu1 }
  0xe6   :  { %v2828_v21 = vpop.f32.mrf.mxu1 }
  0xe8   :  { %v211_v24 = vpop.f32.mrf.mxu1 }
  0xf2   :  { %v2851_v26 = vpop.f32.mrf.mxu1 }
  0xf4   :  { %v415_v28 = vpop.f32.mrf.mxu1 }
  0xf6   :  { %v2852_v30 = vpop.f32.mrf.mxu1 }
  0xf8   :  { %v418_v32 = vpop.f32.mrf.mxu1 }
 0x148   :  { %v2815_v16 = vpop.f32.mrf.mxu0 }
 0x149   :  { %v217_v41 = vadd.f32 %v2827_v17, %v2815_v16 }
 0x14a   :  { %v129_v18 = vpop.f32.mrf.mxu0 }
 0x14b   :  { %v209_v39 = vadd.f32 %v208_v19, %v129_v18 }
 0x14c   :  { %v2816_v20 = vpop.f32.mrf.mxu0 }
 0x14d   :  { %v220_v45 = vadd.f32 %v2828_v21, %v2816_v20 }
 0x14e   :  { %v132_v22 = vpop.f32.mrf.mxu0 }
 0x14f   :  { %v212_v42 = vadd.f32 %v211_v24, %v132_v22  ;;  %v934_v22 = vrot.slane %v3352_v14, %v3347_v13 }
 0x151   :  { %v2875_v34 = vpop.f32.mrf.mxu1 }
 0x153   :  { %v609_v36 = vpop.f32.mrf.mxu1 }
 0x155   :  { %v2876_v38 = vpop.f32.mrf.mxu1 }
 0x157   :  { %v612_v44 = vpop.f32.mrf.mxu1 }
 0x158   :  { %v2839_v23 = vpop.f32.mrf.mxu0 }
 0x159   :  { %v317_v46 = vadd.f32 %v2839_v23, %v217_v41 }
 0x15a   :  { %v300_v25 = vpop.f32.mrf.mxu0 }
 0x15b   :  { %v315_v43 = vadd.f32 %v300_v25, %v209_v39  ;;  %v432_v52 = vadd.f32 %v2851_v26, %v317_v46 }
 0x15c   :  { %v2840_v27 = vpop.f32.mrf.mxu0 }
 0x15d   :  { %v318_v50 = vadd.f32 %v2840_v27, %v220_v45  ;;  %v430_v51 = vadd.f32 %v415_v28, %v315_v43 }
 0x15e   :  { %v303_v29 = vpop.f32.mrf.mxu0 }
 0x15f   :  { %v316_v47 = vadd.f32 %v303_v29, %v212_v42  ;;  %v433_v57 = vadd.f32 %v2852_v30, %v318_v50 }
 0x161   :  { %v2899_v49 = vpop.f32.mrf.mxu1  ;;  %v431_v53 = vadd.f32 %v418_v32, %v316_v47 }
 0x163   :  { %v816_v56 = vpop.f32.mrf.mxu1 }
 0x165   :  { %v2900_v0 = vpop.f32.mrf.mxu1 }
 0x167   :  { %v819_v9 = vpop.f32.mrf.mxu1 }
 0x168   :  { %v2863_v31 = vpop.f32.mrf.mxu0 }
 0x169   :  { %v530_v58 = vadd.f32 %v2863_v31, %v432_v52 }
 0x16a   :  { %v513_v33 = vpop.f32.mrf.mxu0 }
 0x16b   :  { %v528_v54 = vadd.f32 %v513_v33, %v430_v51  ;;  %v626_v1 = vadd.f32 %v2875_v34, %v530_v58 }
 0x16c   :  { %v2864_v35 = vpop.f32.mrf.mxu0 }
 0x16d   :  { %v531_v61 = vadd.f32 %v2864_v35, %v433_v57  ;;  %v624_v62 = vadd.f32 %v609_v36, %v528_v54 }
 0x16e   :  { %v516_v37 = vpop.f32.mrf.mxu0 }
 0x16f   :  { %v529_v59 = vadd.f32 %v516_v37, %v431_v53  ;;  %v627_v6 = vadd.f32 %v2876_v38, %v531_v61 }
 0x171   :  { %v625_v2 = vadd.f32 %v612_v44, %v529_v59 }
 0x178   :  { %v2887_v40 = vpop.f32.mrf.mxu0 }
 0x179   :  { %v735_v7 = vadd.f32 %v2887_v40, %v626_v1 }
 0x17a   :  { %v718_v48 = vpop.f32.mrf.mxu0 }
 0x17b   :  { %v733_v3 = vadd.f32 %v718_v48, %v624_v62  ;;  %v833_v16 = vadd.f32 %v2899_v49, %v735_v7 }
 0x17c   :  { %v2888_v55 = vpop.f32.mrf.mxu0 }
 0x17d   :  { %v736_v11 = vadd.f32 %v2888_v55, %v627_v6  ;;  %v831_v12 = vadd.f32 %v816_v56, %v733_v3 }
 0x17e   :  { %v721_v63 = vpop.f32.mrf.mxu0 }
 0x17f   :  { %v734_v8 = vadd.f32 %v721_v63, %v625_v2  ;;  %v834_v20 = vadd.f32 %v2900_v0, %v736_v11  ;;  %v3141_v11 = vld [vmem:[%s3781_s2 + $0x28] sm:$0xff]  }
 0x181   :  { %v832_v17 = vadd.f32 %v819_v9, %v734_v8  ;;  %v3139_v8 = vld [vmem:[%s3781_s2 + $0x38] sm:$0xff]   ;;  %v3140_v9 = vld [vmem:[%s3781_s2 + $0x30] sm:$0xff]  }
 0x182   :  { %2933 = vmatprep.subr.bf16.mxu0 %v3139_v8 }
 0x183   :  { %2934 = vmatpush3.bf16.msra.mxu0 %v3139_v8 }
 0x184   :  { %2935 = vmatprep.subr.bf16.mxu0 %v3140_v9 }
 0x187   :  { %2936 = vmatpush3.bf16.msra.mxu0 %v3140_v9 }
 0x188   :  { %v2911_v5 = vpop.f32.mrf.mxu0  ;;  %2937 = vmatprep.subr.bf16.mxu0 %v3141_v11 }
 0x189   :  { %v929_v21 = vadd.f32 %v2911_v5, %v833_v16 }
 0x18a   :  { %v912_v10 = vpop.f32.mrf.mxu0 }
 0x18b   :  { %v927_v18 = vadd.f32 %v912_v10, %v831_v12  ;;  %v937_v27 = vadd.f32 %v934_v22, %v929_v21  ;;  %v3246_v10 = vmov 0.0   ;;  %v3142_v12 = vld [vmem:[%s3781_s2 + $0x20] sm:$0xff]   ;;  %2938 = vmatpush3.bf16.msra.mxu0 %v3141_v11  ;;  %v1011_v21 = vsub.s32 2, %v3344_v4 }
 0x18c   :  { %v2912_v15 = vpop.f32.mrf.mxu0  ;;  %1021 = vst [vmem:[#allocation2] sm:$0xff] %v3246_v10  ;;  %1023 = vst.msk [vmem:[#allocation2 + $0x8] sm:$0xff] %vm1022_vm3, %v3246_v10  ;;  %2939 = vmatprep.subr.bf16.mxu0 %v3142_v12 }
 0x18d   :  { %v935_v24 = vadd.f32 %v934_v22, %v927_v18  ;;  %v930_v25 = vadd.f32 %v2912_v15, %v834_v20  ;;  %1024 = vst [vmem:[#allocation2 + $0x10] sm:$0xff] %v3246_v10  ;;  %1025 = vst.msk [vmem:[#allocation2 + $0x18] sm:$0xff] %vm1022_vm3, %v3246_v10  ;;  %v3143_v15 = vld [vmem:[%s3781_s2 + $0x18] sm:$0xff]   ;;  %v998_v20 = vrot.slane %v3352_v14, 1 }
 0x18e   :  { %v915_v19 = vpop.f32.mrf.mxu0  ;;  %1026 = vst [vmem:[#allocation2 + $0x20] sm:$0x3] %v3246_v10  ;;  %1029 = vst [vmem:[#allocation2 + $0x30] sm:$0xff] %v3246_v10 }
 0x18f   :  { %v928_v23 = vadd.f32 %v915_v19, %v832_v17  ;;  %v938_v29 = vadd.f32 %v934_v22, %v930_v25  ;;  %1030 = vst.msk [vmem:[#allocation2 + $0x38] sm:$0xff] %vm1022_vm3, %v3246_v10  ;;  %1031 = vst [vmem:[#allocation2 + $0x40] sm:$0xff] %v3246_v10  ;;  %2940 = vmatpush3.bf16.msra.mxu0 %v3142_v12 }
 0x190   :  { %1032 = vst.msk [vmem:[#allocation2 + $0x48] sm:$0xff] %vm1022_vm3, %v3246_v10  ;;  %1033 = vst [vmem:[#allocation2 + $0x50] sm:$0x3] %v3246_v10  ;;  %2941 = vmatprep.subr.bf16.mxu0 %v3143_v15 }
 0x191   :  { %v936_v26 = vadd.f32 %v934_v22, %v928_v23  ;;  %v3144_v23 = vld [vmem:[%s3781_s2 + $0x10] sm:$0xff]   ;;  %1028 = vst.msk [vmem:[#allocation2 + $0x28] sm:$0x3] %vm1027_vm4, %v3246_v10  ;;  %1034 = vst.msk [vmem:[#allocation2 + $0x58] sm:$0x3] %vm1027_vm4, %v3246_v10 }
 0x193   :  { %v939_v28 = vadd.f32 %v936_v26, %v935_v24  ;;  %2942 = vmatpush3.bf16.msra.mxu0 %v3143_v15  ;;  %v3148_v15 = vld [vmem:[%s3781_s2 + $0xf0] sm:$0xff]  }
 0x194   :  { %2943 = vmatprep.subr.bf16.mxu0 %v3144_v23 }
 0x195   :  { %v940_v30 = vadd.f32 %v939_v28, %v937_v27 }
 0x197   :  { %v941_v31 = vadd.f32 %v940_v30, %v938_v29  ;;  %2944 = vmatpush3.bf16.msra.mxu0 %v3144_v23 }
 0x199   :  { %v942_v32 = vrot.slane %v941_v31, 4 }
 0x19b   :  { %v943_v33 = vadd.f32 %v942_v32, %v941_v31 }
 0x19d   :  { %v944_v34 = vrot.slane %v943_v33, 2 }
 0x19f   :  { %v945_v35 = vadd.f32 %v944_v34, %v943_v33 }
 0x1a1   :  { %v946_v36 = vrot.slane %v945_v35, 1 }
 0x1a3   :  { %v947_v37 = vadd.f32 %v946_v36, %v945_v35 }
 0x1a5   :  { %948 = vrot.lane.b32.xlu0 %v947_v37, %s3243_s10 }
 0x217   :  { %v949_v38 = vpop.permute.xlu0 %948 }
 0x218   :  { %v950_v39 = vadd.f32 %v949_v38, %v947_v37 }
 0x21a   :  { %951 = vrot.lane.b32.xlu1 %v950_v39, %s3244_s11 }
 0x28c   :  { %v952_v40 = vpop.permute.xlu1 %951 }
 0x28d   :  { %v953_v41 = vadd.f32 %v952_v40, %v950_v39 }
 0x28f   :  { %954 = vrot.lane.b32.xlu0 %v953_v41, %s3245_s12 }
 0x301   :  { %v955_v42 = vpop.permute.xlu0 %954 }
 0x302   :  { %v956_v43 = vadd.f32 %v955_v42, %v953_v41  ;;  %v3416_v42 = vld [vmem:[%s3781_s2 + $0xf8] sm:$0xff]  }
 0x304   :  { %957 = vrot.lane.b32.xlu1 %v956_v43, %s3239_s18 }
 0x376   :  { %v958_v44 = vpop.permute.xlu1 %957 }
 0x377   :  { %v959_v45 = vadd.f32 %v958_v44, %v956_v43 }
 0x379   :  { %v960_v46 = vmul.f32 0.001953125, %v959_v45 }
 0x37b   :  { %v964_v47 = vrot.slane %v960_v46, %v3347_v13 }
 0x37d   :  { %v3361_v48 = vsub.f32 %v935_v24, %v964_v47  ;;  %v3363_v49 = vsub.f32 %v936_v26, %v964_v47  ;;  %v3365_v50 = vsub.f32 %v937_v27, %v964_v47  ;;  %v3367_v51 = vsub.f32 %v938_v29, %v964_v47  ;;  %v3145_v27 = vld [vmem:[%s3781_s2 + $0x8] sm:$0xff]   ;;  %v3155_v47 = vld [vmem:[%s3781_s2 + $0x78] sm:$0xff]  }
 0x37e   :  { %v1012_v26 = vrot.slane %v3352_v14, %v1011_v21  ;;  %2945 = vmatprep.subr.bf16.mxu0 %v3145_v27  ;;  %v3146_v14 = vld [vmem:[%s3781_s2] sm:$0xff]   ;;  %2913 = vmatprep.subr.bf16.mxu1 %v3155_v47  ;;  %v3149_v21 = vld [vmem:[%s3781_s2 + $0xe8] sm:$0xff]  }
 0x37f   :  { %v969_v52 = vmul.f32 %v3361_v48, %v3361_v48  ;;  %v970_v53 = vmul.f32 %v3363_v49, %v3363_v49  ;;  %v971_v54 = vmul.f32 %v3365_v50, %v3365_v50  ;;  %v972_v56 = vmul.f32 %v3367_v51, %v3367_v51  ;;  %2946 = vmatpush3.bf16.msra.mxu0 %v3145_v27 }
 0x380   :  { %2947 = vmatprep.subr.bf16.mxu0 %v3146_v14  ;;  %2914 = vmatpush3.bf16.msra.mxu1 %v3155_v47 }
 0x381   :  { %v973_v55 = vadd.f32 %v970_v53, %v969_v52  ;;  %v3160_v52 = vld [vmem:[%s3781_s2 + $0x50] sm:$0xff]   ;;  %v3161_v53 = vld [vmem:[%s3781_s2 + $0x48] sm:$0xff]  }
 0x383   :  { %v974_v57 = vadd.f32 %v973_v55, %v971_v54  ;;  %2948 = vmatpush3.bf16.msra.mxu0 %v3146_v14  ;;  %v3163_v54 = vld [vmem:[%s3781_s2 + $0x40] sm:$0xff]  }
 0x384   :  { %2973 = vmatprep.subr.bf16.mxu0 %v3416_v42 }
 0x385   :  { %v975_v58 = vadd.f32 %v974_v57, %v972_v56  ;;  %v3454_v57 = vld [vmem:[%s3781_s2 + $0xb8] sm:$0xff]  }
 0x387   :  { %v976_v59 = vrot.slane %v975_v58, 4 }
 0x389   :  { %v977_v60 = vadd.f32 %v976_v59, %v975_v58 }
 0x38b   :  { %v978_v61 = vrot.slane %v977_v60, 2 }
 0x38d   :  { %v979_v62 = vadd.f32 %v978_v61, %v977_v60 }
 0x38f   :  { %v980_v63 = vrot.slane %v979_v62, 1 }
 0x391   :  { %v981_v0 = vadd.f32 %v980_v63, %v979_v62 }
 0x393   :  { %982 = vrot.lane.b32.xlu0 %v981_v0, %s3243_s10 }
 0x405   :  { %v983_v1 = vpop.permute.xlu0 %982 }
 0x406   :  { %v984_v2 = vadd.f32 %v983_v1, %v981_v0 }
 0x408   :  { %985 = vrot.lane.b32.xlu1 %v984_v2, %s3244_s11 }
 0x47a   :  { %v986_v3 = vpop.permute.xlu1 %985 }
 0x47b   :  { %v987_v5 = vadd.f32 %v986_v3, %v984_v2 }
 0x47d   :  { %988 = vrot.lane.b32.xlu0 %v987_v5, %s3245_s12 }
 0x4ef   :  { %v989_v6 = vpop.permute.xlu0 %988 }
 0x4f0   :  { %v990_v7 = vadd.f32 %v989_v6, %v987_v5 }
 0x4f2   :  { %991 = vrot.lane.b32.xlu1 %v990_v7, %s3239_s18 }
 0x564   :  { %v992_v16 = vpop.permute.xlu1 %991 }
 0x565   :  { %v993_v17 = vadd.f32 %v992_v16, %v990_v7 }
 0x567   :  { %v994_v18 = vmul.f32 0.001953125, %v993_v17 }
 0x569   :  { %v995_v19 = vadd.f32 1e-05, %v994_v18 }
 0x56b   :  { %3211 = vrsqrt.f32 %v995_v19 }
 0x578   :  { %v3212_v22 = vpop.eup %3211 }
 0x579   :  { %v1000_v24 = vmul.f32 %v3212_v22, %v998_v20 }
 0x57b   :  { %v1004_v25 = vrot.slane %v1000_v24, %v3347_v13 }
 0x57d   :  { %v1005_v28 = vmul.f32 %v1004_v25, %v3361_v48  ;;  %v1006_v29 = vmul.f32 %v1004_v25, %v3363_v49  ;;  %v1007_v30 = vmul.f32 %v1004_v25, %v3365_v50  ;;  %v1008_v31 = vmul.f32 %v1004_v25, %v3367_v51  ;;  %v3156_v48 = vld [vmem:[%s3781_s2 + $0x70] sm:$0xff]   ;;  %v3157_v49 = vld [vmem:[%s3781_s2 + $0x68] sm:$0xff]   ;;  %v3158_v50 = vld [vmem:[%s3781_s2 + $0x60] sm:$0xff]  }
 0x57e   :  { %2915 = vmatprep.subr.bf16.mxu1 %v3156_v48  ;;  %v3159_v51 = vld [vmem:[%s3781_s2 + $0x58] sm:$0xff]  }
 0x57f   :  { %v1013_v32 = vadd.f32 %v1012_v26, %v1005_v28  ;;  %v1014_v33 = vadd.f32 %v1012_v26, %v1006_v29  ;;  %v1015_v34 = vadd.f32 %v1012_v26, %v1007_v30  ;;  %v1016_v35 = vadd.f32 %v1012_v26, %v1008_v31  ;;  %2916 = vmatpush3.bf16.msra.mxu1 %v3156_v48  ;;  %v3150_v28 = vld [vmem:[%s3781_s2 + $0xe0] sm:$0xff]  }
 0x580   :  { %2917 = vmatprep.subr.bf16.mxu1 %v3157_v49 }
 0x581   :  { %v1017_v36 = vmax.f32 %v1013_v32, 0.0  ;;  %v1018_v37 = vmax.f32 %v1014_v33, 0.0  ;;  %v1019_v38 = vmax.f32 %v1015_v34, 0.0  ;;  %v1020_v39 = vmax.f32 %v1016_v35, 0.0 }
 0x583   :  { %v1040_v40 = vrot.slane %v1017_v36, 7  ;;  %v1041_v41 = vrot.slane %v1018_v37, 7  ;;  %v1043_v44 = vrot.slane %v1019_v38, 7  ;;  %v1044_v45 = vrot.slane %v1020_v39, 7  ;;  %2918 = vmatpush3.bf16.msra.mxu1 %v3157_v49  ;;  %v3151_v37 = vld [vmem:[%s3781_s2 + $0xd8] sm:$0xff]  }
 0x584   :  { %2919 = vmatprep.subr.bf16.mxu1 %v3158_v50 }
 0x585   :  { %1046 = vrot.lane.b32.xlu0 %v1040_v40, %s3243_s10  ;;  %v1042_v43 = vsel %vm1039_vm5, %v1040_v40, %v1041_v41  ;;  %v1045_v46 = vsel %vm1039_vm5, %v1043_v44, %v1044_v45 }
 0x586   :  { %1048 = vrot.lane.b32.xlu1 %v1042_v43, %s3243_s10 }
 0x587   :  { %2920 = vmatpush3.bf16.msra.mxu1 %v3158_v50 }
 0x588   :  { %2921 = vmatprep.subr.bf16.mxu1 %v3159_v51 }
 0x589   :  { %1052 = vrot.lane.b32.xlu0 %v1043_v44, %s3243_s10  ;;  %v3152_v44 = vld [vmem:[%s3781_s2 + $0xd0] sm:$0xff]  }
 0x58a   :  { %1054 = vrot.lane.b32.xlu1 %v1045_v46, %s3243_s10 }
 0x58b   :  { %2922 = vmatpush3.bf16.msra.mxu1 %v3159_v51 }
 0x58c   :  { %2923 = vmatprep.subr.bf16.mxu1 %v3160_v52 }
 0x58d   :  { %1050 = vrot.lane.b32.xlu0 %v1041_v41, %s3243_s10 }
 0x58e   :  { %1056 = vrot.lane.b32.xlu1 %v1044_v45, %s3243_s10  ;;  %v3153_v45 = vld [vmem:[%s3781_s2 + $0xc8] sm:$0xff]  }
 0x58f   :  { %2924 = vmatpush3.bf16.msra.mxu1 %v3160_v52  ;;  %v3154_v52 = vld [vmem:[%s3781_s2 + $0xc0] sm:$0xff]  }
 0x590   :  { %2925 = vmatprep.subr.bf16.mxu1 %v3161_v53 }
 0x593   :  { %2926 = vmatpush3.bf16.msra.mxu1 %v3161_v53 }
 0x594   :  { %2927 = vmatprep.subr.bf16.mxu1 %v3163_v54 }
 0x597   :  { %2928 = vmatpush3.bf16.msra.mxu1 %v3163_v54 }
 0x598   :  { %2953 = vmatprep.subr.bf16.mxu1 %v3454_v57 }
 0x5f7   :  { %v1047_v55 = vpop.permute.xlu0 %1046 }
 0x5f8   :  { %1065 = vst.msk [vmem:[#allocation2] sm:$0xfe] %vm1064_vm6, %v1047_v55  ;;  %v1049_v56 = vpop.permute.xlu1 %1048 }
 0x5f9   :  { %1067 = vst.msk [vmem:[#allocation2 + $0x8] sm:$0xfe] %vm1066_vm7, %v1047_v55 }
 0x5fa   :  { %1069 = vst.msk [vmem:[#allocation2 + $0x10] sm:$0xff] %vm1068_vm8, %v1049_v56 }
 0x5fb   :  { %1071 = vst.msk [vmem:[#allocation2 + $0x18] sm:$0xff] %vm1070_vm9, %v1049_v56  ;;  %v1053_v58 = vpop.permute.xlu0 %1052 }
 0x5fc   :  { %1076 = vst.msk [vmem:[#allocation2 + $0x30] sm:$0xfe] %vm1064_vm6, %v1053_v58  ;;  %v1055_v59 = vpop.permute.xlu1 %1054 }
 0x5fd   :  { %1077 = vst.msk [vmem:[#allocation2 + $0x38] sm:$0xfe] %vm1066_vm7, %v1053_v58 }
 0x5fe   :  { %1078 = vst.msk [vmem:[#allocation2 + $0x40] sm:$0xff] %vm1068_vm8, %v1055_v59 }
 0x5ff   :  { %1079 = vst.msk [vmem:[#allocation2 + $0x48] sm:$0xff] %vm1070_vm9, %v1055_v59  ;;  %v1051_v60 = vpop.permute.xlu0 %1050  ;;  %v3461_v62 = vld [vmem:[#allocation2] sm:$0xff] }
 0x600   :  { %v3459_v61 = vld [vmem:[#allocation2 + $0x8] sm:$0xff]  ;;  %1073 = vst.msk [vmem:[#allocation2 + $0x20] sm:$0x1] %vm1072_vm10, %v1051_v60  ;;  %v1057_v63 = vpop.permute.xlu1 %1056  ;;  %v1479_v11 = vrot.slane %v3461_v62, 1  ;;  %v1899_v50 = vrot.slane %v3461_v62, 2 }
 0x601   :  { %1075 = vst.msk [vmem:[#allocation2 + $0x28] sm:$0x1] %vm1074_vm11, %v1051_v60  ;;  %v3465_v1 = vld [vmem:[#allocation2 + $0x10] sm:$0xff]  ;;  %1081 = vst.msk [vmem:[#allocation2 + $0x58] sm:$0x1] %vm1074_vm11, %v1057_v63  ;;  %v1619_v23 = vrot.slane %v3459_v61, 1 }
 0x602   :  { %v3463_v0 = vld [vmem:[#allocation2 + $0x18] sm:$0xff]  ;;  %1080 = vst.msk [vmem:[#allocation2 + $0x50] sm:$0x1] %vm1072_vm10, %v1057_v63  ;;  %v1094_v3 = vpack.c.bf16 %v3465_v1, %v3461_v62  ;;  %v1480_v12 = vrot.slane %v3465_v1, 1  ;;  %v2033_v48 = vrot.slane %v3459_v61, 2  ;;  %v1900_v51 = vrot.slane %v3465_v1, 2 }
 0x603   :  { %v1112_v2 = vpack.c.bf16 %v3463_v0, %v3459_v61  ;;  %v3475_v6 = vld [vmem:[#allocation2 + $0x30] sm:$0xff]  ;;  %v1620_v24 = vrot.slane %v3463_v0, 1  ;;  %v2034_v49 = vrot.slane %v3463_v0, 2 }
 0x604   :  { %1135 = vrot.lane.b32.xlu0 %v1094_v3, %s3242_s8  ;;  %v3473_v5 = vld [vmem:[#allocation2 + $0x38] sm:$0xff]  ;;  %2949 = vmatprep.mubr.bf16.mxu0 %v1094_v3  ;;  %v1481_v19 = vsel %vm325_vm0, %v1479_v11, %v1480_v12  ;;  %v1484_v35 = vrot.slane %v3475_v6, 1  ;;  %v1904_v61 = vrot.slane %v3475_v6, 2  ;;  %v1901_v63 = vsel %vm628_vm2, %v1899_v50, %v1900_v51  ;;  %v3166_v11 = vld [vmem:[%s3781_s2 + $0x168] sm:$0xff]  }
 0x605   :  { %1137 = vrot.lane.b32.xlu1 %v1112_v2, %s3242_s8  ;;  %v3479_v8 = vld [vmem:[#allocation2 + $0x40] sm:$0xff]  ;;  %v1621_v32 = vsel %vm325_vm0, %v1619_v23, %v1620_v24  ;;  %v1624_v33 = vrot.slane %v3473_v5, 1  ;;  %v2038_v58 = vrot.slane %v3473_v5, 2  ;;  %v2035_v59 = vsel %vm628_vm2, %v2033_v48, %v2034_v49  ;;  %v3182_v50 = vld [vmem:[%s3781_s2 + $0x1e8] sm:$0xff]  }
 0x606   :  { %v3477_v7 = vld [vmem:[#allocation2 + $0x48] sm:$0xff]  ;;  %v1095_v10 = vpack.c.bf16 %v3479_v8, %v3475_v6  ;;  %v1485_v14 = vrot.slane %v3479_v8, 1  ;;  %v1905_v62 = vrot.slane %v3479_v8, 2 }
 0x607   :  { %v1113_v9 = vpack.c.bf16 %v3477_v7, %v3473_v5  ;;  %v3492_v16 = vld [vmem:[#allocation2 + $0x20] sm:$0x3]  ;;  %v1625_v34 = vrot.slane %v3477_v7, 1  ;;  %v2039_v60 = vrot.slane %v3477_v7, 2  ;;  %v3162_v5 = vld [vmem:[%s3781_s2 + $0x178] sm:$0xff]  }
 0x608   :  { %1139 = vrot.lane.b32.xlu0 %v1095_v10, %s3242_s8  ;;  %v3494_v17 = vld [vmem:[#allocation2 + $0x28] sm:$0x3]  ;;  %2950 = vmatmul.mubr.bf16.vlgmr.msra.gmra.mxu0 %v1095_v10  ;;  %v1482_v18 = vrot.slane %v3492_v16, 1  ;;  %v3508_v26 = vld [vmem:[#allocation2 + $0x58] sm:$0x3]  ;;  %v1486_v41 = vsel %vm325_vm0, %v1484_v35, %v1485_v14  ;;  %v1902_v47 = vrot.slane %v3492_v16, 2  ;;  %v1906_v7 = vsel %vm628_vm2, %v1904_v61, %v1905_v62 }
 0x609   :  { %1141 = vrot.lane.b32.xlu1 %v1113_v9, %s3242_s8  ;;  %2974 = vmatpush3.bf16.msra.mxu0 %v3416_v42  ;;  %v1622_v22 = vrot.slane %v3494_v17, 1  ;;  %v3510_v27 = vld [vmem:[#allocation2 + $0x50] sm:$0x3]  ;;  %v1627_v30 = vrot.slane %v3508_v26, 1  ;;  %v1626_v40 = vsel %vm325_vm0, %v1624_v33, %v1625_v34  ;;  %v2036_v46 = vrot.slane %v3494_v17, 2  ;;  %v3174_v17 = vld [vmem:[%s3781_s2 + $0x148] sm:$0xff]  }
 0x60a   :  { %2975 = vmatprep.subr.bf16.mxu0 %v3148_v15  ;;  %v1483_v20 = vsel %vm325_vm0, %v1480_v12, %v1482_v18  ;;  %v1487_v31 = vrot.slane %v3510_v27, 1  ;;  %v1903_v54 = vsel %vm628_vm2, %v1900_v51, %v1902_v47  ;;  %v2041_v55 = vrot.slane %v3508_v26, 2  ;;  %v3168_v12 = vld [vmem:[%s3781_s2 + $0x160] sm:$0xff]   ;;  %v3172_v16 = vld [vmem:[%s3781_s2 + $0x150] sm:$0xff]   ;;  %v3173_v35 = vld [vmem:[%s3781_s2 + $0x98] sm:$0xff]  }
 0x60b   :  { %v1493_v25 = vpack.c.bf16 %v1483_v20, %v1481_v19  ;;  %v1623_v29 = vsel %vm325_vm0, %v1620_v24, %v1622_v22  ;;  %v1628_v38 = vsel %vm325_vm0, %v1625_v34, %v1627_v30  ;;  %v2037_v53 = vsel %vm628_vm2, %v2034_v49, %v2036_v46  ;;  %v3176_v18 = vld [vmem:[%s3781_s2 + $0x140] sm:$0xff]   ;;  %v3178_v19 = vld [vmem:[%s3781_s2 + $0x1f8] sm:$0xff]  }
 0x60c   :  { %1359 = vrot.lane.b32.xlu0 %v1094_v3, %s3247_s30  ;;  %v1633_v36 = vpack.c.bf16 %v1623_v29, %v1621_v32  ;;  %v1488_v39 = vsel %vm325_vm0, %v1485_v14, %v1487_v31  ;;  %v1634_v42 = vpack.c.bf16 %v1628_v38, %v1626_v40  ;;  %v1907_v56 = vrot.slane %v3510_v27, 2  ;;  %v3169_v29 = vld [vmem:[%s3781_s2 + $0xa8] sm:$0xff]   ;;  %v3171_v33 = vld [vmem:[%s3781_s2 + $0xa0] sm:$0xff]   ;;  %v3181_v49 = vld [vmem:[%s3781_s2 + $0x138] sm:$0xff]  }
 0x60d   :  { %1361 = vrot.lane.b32.xlu1 %v1112_v2, %s3247_s30  ;;  %2976 = vmatpush3.bf16.msra.mxu0 %v3148_v15  ;;  %v1494_v43 = vpack.c.bf16 %v1488_v39, %v1486_v41  ;;  %v2047_v0 = vpack.c.bf16 %v2037_v53, %v2035_v59  ;;  %v3565_v1 = vpack.c.bf16 %v1903_v54, %v1901_v63  ;;  %v3170_v15 = vld [vmem:[%s3781_s2 + $0x158] sm:$0xff]   ;;  %v3177_v40 = vld [vmem:[%s3781_s2 + $0x88] sm:$0xff]   ;;  %v3184_v54 = vld [vmem:[%s3781_s2 + $0x1e0] sm:$0xff]  }
 0x60e   :  { %2989 = vmatprep.mubr.bf16.mxu0 %v1493_v25  ;;  %2977 = vmatprep.subr.bf16.mxu0 %v3149_v21  ;;  %v2042_v2 = vsel %vm628_vm2, %v2039_v60, %v2041_v55  ;;  %v1908_v3 = vsel %vm628_vm2, %v1905_v62, %v1907_v56  ;;  %v2040_v6 = vsel %vm628_vm2, %v2038_v58, %v2039_v60  ;;  %v3185_v56 = vld [vmem:[%s3781_s2 + $0x128] sm:$0xff]   ;;  %v3186_v58 = vld [vmem:[%s3781_s2 + $0x1d8] sm:$0xff]   ;;  %v3187_v59 = vld [vmem:[%s3781_s2 + $0x120] sm:$0xff]  }
 0x60f   :  { %v2048_v8 = vpack.c.bf16 %v2042_v2, %v2040_v6  ;;  %v3188_v60 = vld [vmem:[%s3781_s2 + $0x1d0] sm:$0xff]   ;;  %v3189_v61 = vld [vmem:[%s3781_s2 + $0x118] sm:$0xff]   ;;  %v3190_v62 = vld [vmem:[%s3781_s2 + $0x1c8] sm:$0xff]  }
 0x610   :  { %1363 = vrot.lane.b32.xlu0 %v1095_v10, %s3247_s30  ;;  %v3164_v10 = vld [vmem:[%s3781_s2 + $0x170] sm:$0xff]   ;;  %v3193_v2 = vld [vmem:[%s3781_s2 + $0x108] sm:$0xff]   ;;  %v3194_v6 = vld [vmem:[%s3781_s2 + $0x100] sm:$0xff]  }
 0x611   :  { %1365 = vrot.lane.b32.xlu1 %v1113_v9, %s3247_s30  ;;  %2978 = vmatpush3.bf16.msra.mxu0 %v3149_v21  ;;  %v3577_v9 = vpack.c.bf16 %v1908_v3, %v1906_v7  ;;  %v3191_v63 = vld [vmem:[%s3781_s2 + $0x110] sm:$0xff]  }
 0x612   :  { %2979 = vmatprep.subr.bf16.mxu0 %v3150_v28 }
 0x614   :  { %1656 = vrot.lane.b32.xlu0 %v1493_v25, %s3242_s8 }
 0x615   :  { %1658 = vrot.lane.b32.xlu1 %v1633_v36, %s3242_s8  ;;  %2980 = vmatpush3.bf16.msra.mxu0 %v3150_v28 }
 0x616   :  { %2981 = vmatprep.subr.bf16.mxu0 %v3151_v37 }
 0x618   :  { %1660 = vrot.lane.b32.xlu0 %v1494_v43, %s3242_s8 }
 0x619   :  { %1662 = vrot.lane.b32.xlu1 %v1634_v42, %s3242_s8  ;;  %2982 = vmatpush3.bf16.msra.mxu0 %v3151_v37  ;;  %v3175_v37 = vld [vmem:[%s3781_s2 + $0x90] sm:$0xff]  }
 0x61a   :  { %2983 = vmatprep.subr.bf16.mxu0 %v3152_v44 }
 0x61c   :  { %1786 = vrot.lane.b32.xlu0 %v1493_v25, %s3247_s30  ;;  %v3167_v25 = vld [vmem:[%s3781_s2 + $0xb0] sm:$0xff]  }
 0x61d   :  { %1788 = vrot.lane.b32.xlu1 %v1633_v36, %s3247_s30  ;;  %2984 = vmatpush3.bf16.msra.mxu0 %v3152_v44  ;;  %v3179_v44 = vld [vmem:[%s3781_s2 + $0x80] sm:$0xff]  }
 0x61e   :  { %2985 = vmatprep.subr.bf16.mxu0 %v3153_v45 }
 0x620   :  { %1790 = vrot.lane.b32.xlu0 %v1494_v43, %s3247_s30 }
 0x621   :  { %1792 = vrot.lane.b32.xlu1 %v1634_v42, %s3247_s30  ;;  %2986 = vmatpush3.bf16.msra.mxu0 %v3153_v45  ;;  %v3180_v45 = vld [vmem:[%s3781_s2 + $0x1f0] sm:$0xff]  }
 0x622   :  { %2987 = vmatprep.subr.bf16.mxu0 %v3154_v52 }
 0x624   :  { %2070 = vrot.lane.b32.xlu0 %v3565_v1, %s3242_s8 }
 0x625   :  { %2072 = vrot.lane.b32.xlu1 %v2047_v0, %s3242_s8  ;;  %2988 = vmatpush3.bf16.msra.mxu0 %v3154_v52  ;;  %v3183_v52 = vld [vmem:[%s3781_s2 + $0x130] sm:$0xff]  }
 0x626   :  { %3013 = vmatprep.subr.bf16.mxu0 %v3162_v5 }
 0x628   :  { %2074 = vrot.lane.b32.xlu0 %v3577_v9, %s3242_s8  ;;  %2990 = vmatmul.mubr.bf16.vlgmr.msra.gmra.mxu0 %v1494_v43 }
 0x629   :  { %2076 = vrot.lane.b32.xlu1 %v2048_v8, %s3242_s8  ;;  %3014 = vmatpush3.bf16.msra.mxu0 %v3162_v5 }
 0x62a   :  { %3015 = vmatprep.subr.bf16.mxu0 %v3164_v10 }
 0x62c   :  { %2200 = vrot.lane.b32.xlu0 %v3565_v1, %s3247_s30 }
 0x62d   :  { %2202 = vrot.lane.b32.xlu1 %v2047_v0, %s3247_s30  ;;  %3016 = vmatpush3.bf16.msra.mxu0 %v3164_v10  ;;  %v3192_v0 = vld [vmem:[%s3781_s2 + $0x1c0] sm:$0xff]   ;;  %v3196_v10 = vld [vmem:[%s3781_s2 + $0x1b0] sm:$0xff]  }
 0x62e   :  { %3017 = vmatprep.subr.bf16.mxu0 %v3166_v11 }
 0x630   :  { %2204 = vrot.lane.b32.xlu0 %v3577_v9, %s3247_s30 }
 0x631   :  { %2206 = vrot.lane.b32.xlu1 %v2048_v8, %s3247_s30  ;;  %3018 = vmatpush3.bf16.msra.mxu0 %v3166_v11  ;;  %v3195_v8 = vld [vmem:[%s3781_s2 + $0x1b8] sm:$0xff]  }
 0x632   :  { %3019 = vmatprep.subr.bf16.mxu0 %v3168_v12 }
 0x635   :  { %3020 = vmatpush3.bf16.msra.mxu0 %v3168_v12  ;;  %v3197_v12 = vld [vmem:[%s3781_s2 + $0x1a8] sm:$0xff]  }
 0x636   :  { %3021 = vmatprep.subr.bf16.mxu0 %v3170_v15 }
 0x639   :  { %3022 = vmatpush3.bf16.msra.mxu0 %v3170_v15  ;;  %v3198_v15 = vld [vmem:[%s3781_s2 + $0x1a0] sm:$0xff]  }
 0x63a   :  { %3023 = vmatprep.subr.bf16.mxu0 %v3172_v16 }
 0x63d   :  { %3024 = vmatpush3.bf16.msra.mxu0 %v3172_v16  ;;  %v3199_v16 = vld [vmem:[%s3781_s2 + $0x198] sm:$0xff]  }
 0x63e   :  { %3025 = vmatprep.subr.bf16.mxu0 %v3174_v17 }
 0x641   :  { %3026 = vmatpush3.bf16.msra.mxu0 %v3174_v17  ;;  %v3201_v17 = vld [vmem:[%s3781_s2 + $0x188] sm:$0xff]  }
 0x642   :  { %3027 = vmatprep.subr.bf16.mxu0 %v3176_v18 }
 0x645   :  { %3028 = vmatpush3.bf16.msra.mxu0 %v3176_v18  ;;  %v3202_v18 = vld [vmem:[%s3781_s2 + $0x180] sm:$0xff]  }
 0x646   :  { %3053 = vmatprep.subr.bf16.mxu0 %v3178_v19 }
 0x676   :  { %v1136_v20 = vpop.permute.xlu0 %1135 }
 0x677   :  { %v1138_v21 = vpop.permute.xlu1 %1137 }
 0x678   :  { %v1144_v22 = vsel %vm1143_vm12, %v1136_v20, %v1138_v21 }
 0x679   :  { %2929 = vmatprep.mubr.bf16.mxu1 %v1144_v22  ;;  %v3204_v22 = vld [vmem:[%s3781_s2 + $0x230] sm:$0xff]  }
 0x67a   :  { %v1140_v23 = vpop.permute.xlu0 %1139 }
 0x67b   :  { %v1142_v24 = vpop.permute.xlu1 %1141 }
 0x67c   :  { %v1145_v26 = vsel %vm1143_vm12, %v1140_v23, %v1142_v24  ;;  %v3205_v24 = vld [vmem:[%s3781_s2 + $0x228] sm:$0xff]  }
 0x67d   :  { %2930 = vmatmul.mubr.bf16.vlgmr.msra.gmra.mxu1 %v1145_v26  ;;  %v3208_v26 = vld [vmem:[%s3781_s2 + $0x210] sm:$0xff]  }
 0x67e   :  { %2954 = vmatpush3.bf16.msra.mxu1 %v3454_v57  ;;  %v1360_v27 = vpop.permute.xlu0 %1359 }
 0x67f   :  { %v1362_v28 = vpop.permute.xlu1 %1361  ;;  %2955 = vmatprep.subr.bf16.mxu1 %v3167_v25 }
 0x680   :  { %v1368_v30 = vsel %vm1367_vm13, %v1360_v27, %v1362_v28  ;;  %v3209_v27 = vld [vmem:[%s3781_s2 + $0x208] sm:$0xff]   ;;  %v3210_v28 = vld [vmem:[%s3781_s2 + $0x200] sm:$0xff]  }
 0x681   :  { %2969 = vmatprep.mubr.bf16.mxu1 %v1368_v30 }
 0x682   :  { %2956 = vmatpush3.bf16.msra.mxu1 %v3167_v25  ;;  %v1364_v31 = vpop.permute.xlu0 %1363  ;;  %v3206_v25 = vld [vmem:[%s3781_s2 + $0x220] sm:$0xff]  }
 0x683   :  { %v1366_v32 = vpop.permute.xlu1 %1365  ;;  %2957 = vmatprep.subr.bf16.mxu1 %v3169_v29 }
 0x684   :  { %v1369_v53 = vsel %vm1367_vm13, %v1364_v31, %v1366_v32 }
 0x686   :  { %2958 = vmatpush3.bf16.msra.mxu1 %v3169_v29  ;;  %v1657_v57 = vpop.permute.xlu0 %1656 }
 0x687   :  { %v1659_v34 = vpop.permute.xlu1 %1658  ;;  %2959 = vmatprep.subr.bf16.mxu1 %v3171_v33 }
 0x688   :  { %v1664_v55 = vsel %vm1143_vm12, %v1657_v57, %v1659_v34 }
 0x68a   :  { %2960 = vmatpush3.bf16.msra.mxu1 %v3171_v33  ;;  %v3628_v14 = vpop.permute.xlu0 %1660 }
 0x68b   :  { %v3630_v36 = vpop.permute.xlu1 %1662  ;;  %2961 = vmatprep.subr.bf16.mxu1 %v3173_v35 }
 0x68c   :  { %v1665_v11 = vsel %vm1143_vm12, %v3628_v14, %v3630_v36 }
 0x68e   :  { %2962 = vmatpush3.bf16.msra.mxu1 %v3173_v35  ;;  %v1787_v38 = vpop.permute.xlu0 %1786 }
 0x68f   :  { %v1789_v39 = vpop.permute.xlu1 %1788  ;;  %2963 = vmatprep.subr.bf16.mxu1 %v3175_v37 }
 0x690   :  { %v1794_v41 = vsel %vm1367_vm13, %v1787_v38, %v1789_v39 }
 0x691   :  { %3029 = vmatprep.mubr.bf16.mxu0 %v1794_v41 }
 0x692   :  { %2964 = vmatpush3.bf16.msra.mxu1 %v3175_v37  ;;  %v1791_v42 = vpop.permute.xlu0 %1790 }
 0x693   :  { %v1793_v43 = vpop.permute.xlu1 %1792  ;;  %2965 = vmatprep.subr.bf16.mxu1 %v3177_v40 }
 0x694   :  { %v1795_v46 = vsel %vm1367_vm13, %v1791_v42, %v1793_v43 }
 0x695   :  { %3030 = vmatmul.mubr.bf16.vlgmr.msra.gmra.mxu0 %v1795_v46 }
 0x696   :  { %2966 = vmatpush3.bf16.msra.mxu1 %v3177_v40  ;;  %3054 = vmatpush3.bf16.msra.mxu0 %v3178_v19  ;;  %v2071_v47 = vpop.permute.xlu0 %2070  ;;  %v3203_v19 = vld [vmem:[%s3781_s2 + $0x238] sm:$0xff]  }
 0x697   :  { %v2073_v48 = vpop.permute.xlu1 %2072  ;;  %2967 = vmatprep.subr.bf16.mxu1 %v3179_v44  ;;  %3055 = vmatprep.subr.bf16.mxu0 %v3180_v45 }
 0x698   :  { %v2078_v51 = vsel %vm1143_vm12, %v2071_v47, %v2073_v48 }
 0x699   :  { %3069 = vmatprep.mubr.bf16.mxu0 %v2078_v51 }
 0x69a   :  { %2968 = vmatpush3.bf16.msra.mxu1 %v3179_v44  ;;  %3056 = vmatpush3.bf16.msra.mxu0 %v3180_v45  ;;  %v2075_v3 = vpop.permute.xlu0 %2074 }
 0x69b   :  { %2993 = vmatprep.subr.bf16.mxu1 %v3181_v49  ;;  %3057 = vmatprep.subr.bf16.mxu0 %v3182_v50  ;;  %v2077_v5 = vpop.permute.xlu1 %2076 }
 0x69c   :  { %v2079_v7 = vsel %vm1143_vm12, %v2075_v3, %v2077_v5 }
 0x69d   :  { %2970 = vmatmul.mubr.bf16.vlgmr.msra.gmra.mxu1 %v1369_v53 }
 0x69e   :  { %2994 = vmatpush3.bf16.msra.mxu1 %v3181_v49  ;;  %3009 = vmatprep.mubr.bf16.mxu1 %v1664_v55  ;;  %v2201_v20 = vpop.permute.xlu0 %2200 }
 0x69f   :  { %3058 = vmatpush3.bf16.msra.mxu0 %v3182_v50  ;;  %2995 = vmatprep.subr.bf16.mxu1 %v3183_v52  ;;  %v2203_v21 = vpop.permute.xlu1 %2202 }
 0x6a0   :  { %3059 = vmatprep.subr.bf16.mxu0 %v3184_v54  ;;  %v2208_v23 = vsel %vm1367_vm13, %v2201_v20, %v2203_v21 }
 0x6a2   :  { %2996 = vmatpush3.bf16.msra.mxu1 %v3183_v52  ;;  %v2205_v29 = vpop.permute.xlu0 %2204 }
 0x6a3   :  { %3060 = vmatpush3.bf16.msra.mxu0 %v3184_v54  ;;  %2997 = vmatprep.subr.bf16.mxu1 %v3185_v56  ;;  %v2207_v30 = vpop.permute.xlu1 %2206 }
 0x6a4   :  { %3061 = vmatprep.subr.bf16.mxu0 %v3186_v58  ;;  %v2209_v31 = vsel %vm1367_vm13, %v2205_v29, %v2207_v30 }
 0x6a6   :  { %2998 = vmatpush3.bf16.msra.mxu1 %v3185_v56 }
 0x6a7   :  { %3062 = vmatpush3.bf16.msra.mxu0 %v3186_v58  ;;  %2999 = vmatprep.subr.bf16.mxu1 %v3187_v59 }
 0x6a8   :  { %3063 = vmatprep.subr.bf16.mxu0 %v3188_v60 }
 0x6aa   :  { %3000 = vmatpush3.bf16.msra.mxu1 %v3187_v59 }
 0x6ab   :  { %3064 = vmatpush3.bf16.msra.mxu0 %v3188_v60  ;;  %3001 = vmatprep.subr.bf16.mxu1 %v3189_v61 }
 0x6ac   :  { %3065 = vmatprep.subr.bf16.mxu0 %v3190_v62 }
 0x6ae   :  { %3002 = vmatpush3.bf16.msra.mxu1 %v3189_v61 }
 0x6af   :  { %3066 = vmatpush3.bf16.msra.mxu0 %v3190_v62  ;;  %3003 = vmatprep.subr.bf16.mxu1 %v3191_v63 }
 0x6b0   :  { %3067 = vmatprep.subr.bf16.mxu0 %v3192_v0 }
 0x6b2   :  { %3004 = vmatpush3.bf16.msra.mxu1 %v3191_v63 }
 0x6b3   :  { %3068 = vmatpush3.bf16.msra.mxu0 %v3192_v0  ;;  %3005 = vmatprep.subr.bf16.mxu1 %v3193_v2 }
 0x6b6   :  { %3070 = vmatmul.mubr.bf16.vlgmr.msra.gmra.mxu0 %v2079_v7  ;;  %3006 = vmatpush3.bf16.msra.mxu1 %v3193_v2 }
 0x6b7   :  { %3007 = vmatprep.subr.bf16.mxu1 %v3194_v6 }
 0x6ba   :  { %3008 = vmatpush3.bf16.msra.mxu1 %v3194_v6 }
 0x6bb   :  { %3033 = vmatprep.subr.bf16.mxu1 %v3195_v8 }
 0x6bd   :  { %3010 = vmatmul.mubr.bf16.vlgmr.msra.gmra.mxu1 %v1665_v11 }
 0x6be   :  { %3034 = vmatpush3.bf16.msra.mxu1 %v3195_v8  ;;  %3049 = vmatprep.mubr.bf16.mxu1 %v3565_v1  ;;  %v3200_v1 = vld [vmem:[%s3781_s2 + $0x190] sm:$0xff]  }
 0x6bf   :  { %3035 = vmatprep.subr.bf16.mxu1 %v3196_v10 }
 0x6c2   :  { %3036 = vmatpush3.bf16.msra.mxu1 %v3196_v10 }
 0x6c3   :  { %3037 = vmatprep.subr.bf16.mxu1 %v3197_v12 }
 0x6c6   :  { %3038 = vmatpush3.bf16.msra.mxu1 %v3197_v12 }
 0x6c7   :  { %3039 = vmatprep.subr.bf16.mxu1 %v3198_v15 }
 0x6c8   :  { %v2951_v57 = vpop.f32.mrf.mxu0 }
 0x6ca   :  { %3040 = vmatpush3.bf16.msra.mxu1 %v3198_v15  ;;  %v1327_v35 = vpop.f32.mrf.mxu0 }
 0x6cb   :  { %3041 = vmatprep.subr.bf16.mxu1 %v3199_v16 }
 0x6cc   :  { %v2952_v36 = vpop.f32.mrf.mxu0 }
 0x6ce   :  { %3042 = vmatpush3.bf16.msra.mxu1 %v3199_v16  ;;  %v1330_v38 = vpop.f32.mrf.mxu0 }
 0x6cf   :  { %3043 = vmatprep.subr.bf16.mxu1 %v3200_v1 }
 0x6d2   :  { %3044 = vmatpush3.bf16.msra.mxu1 %v3200_v1 }
 0x6d3   :  { %3045 = vmatprep.subr.bf16.mxu1 %v3201_v17 }
 0x6d6   :  { %3046 = vmatpush3.bf16.msra.mxu1 %v3201_v17 }
 0x6d7   :  { %3047 = vmatprep.subr.bf16.mxu1 %v3202_v18 }
 0x6da   :  { %3048 = vmatpush3.bf16.msra.mxu1 %v3202_v18 }
 0x6db   :  { %3073 = vmatprep.subr.bf16.mxu1 %v3203_v19 }
 0x6dd   :  { %3050 = vmatmul.mubr.bf16.vlgmr.msra.gmra.mxu1 %v3577_v9  ;;  %v3207_v9 = vld [vmem:[%s3781_s2 + $0x218] sm:$0xff]  }
 0x6de   :  { %3074 = vmatpush3.bf16.msra.mxu1 %v3203_v19  ;;  %3089 = vmatprep.mubr.bf16.mxu1 %v2208_v23 }
 0x6df   :  { %3075 = vmatprep.subr.bf16.mxu1 %v3204_v22 }
 0x6e2   :  { %3076 = vmatpush3.bf16.msra.mxu1 %v3204_v22 }
 0x6e3   :  { %3077 = vmatprep.subr.bf16.mxu1 %v3205_v24 }
 0x6e6   :  { %3078 = vmatpush3.bf16.msra.mxu1 %v3205_v24 }
 0x6e7   :  { %3079 = vmatprep.subr.bf16.mxu1 %v3206_v25 }
 0x6e8   :  { %v2991_v40 = vpop.f32.mrf.mxu0 }
 0x6ea   :  { %3080 = vmatpush3.bf16.msra.mxu1 %v3206_v25  ;;  %v1594_v42 = vpop.f32.mrf.mxu0 }
 0x6eb   :  { %3081 = vmatprep.subr.bf16.mxu1 %v3207_v9 }
 0x6ec   :  { %v2992_v44 = vpop.f32.mrf.mxu0 }
 0x6ee   :  { %3082 = vmatpush3.bf16.msra.mxu1 %v3207_v9  ;;  %v1597_v46 = vpop.f32.mrf.mxu0 }
 0x6ef   :  { %3083 = vmatprep.subr.bf16.mxu1 %v3208_v26 }
 0x6f2   :  { %3084 = vmatpush3.bf16.msra.mxu1 %v3208_v26 }
 0x6f3   :  { %3085 = vmatprep.subr.bf16.mxu1 %v3209_v27 }
 0x6f6   :  { %3086 = vmatpush3.bf16.msra.mxu1 %v3209_v27  ;;  %v2315_v27 = vsub.s32 3, %v3344_v4 }
 0x6f7   :  { %3087 = vmatprep.subr.bf16.mxu1 %v3210_v28 }
 0x6fa   :  { %3088 = vmatpush3.bf16.msra.mxu1 %v3210_v28 }
 0x6fd   :  { %3090 = vmatmul.mubr.bf16.vlgmr.msra.gmra.mxu1 %v2209_v31 }
 0x73d   :  { %v2931_v32 = vpop.f32.mrf.mxu1 }
 0x73e   :  { %v1336_v55 = vadd.f32 %v2951_v57, %v2931_v32 }
 0x73f   :  { %v1230_v33 = vpop.f32.mrf.mxu1 }
 0x740   :  { %v1328_v52 = vadd.f32 %v1327_v35, %v1230_v33  ;;  %v3751_v35 = vld [vmem:[%s3782_s3] sm:$0x3f] }
 0x741   :  { %v2932_v34 = vpop.f32.mrf.mxu1 }
 0x742   :  { %v1339_v59 = vadd.f32 %v2952_v36, %v2932_v34 }
 0x743   :  { %v1233_v14 = vpop.f32.mrf.mxu1 }
 0x744   :  { %v1331_v56 = vadd.f32 %v1330_v38, %v1233_v14  ;;  %v2316_v14 = vrot.slane %v3751_v35, %v2315_v27 }
 0x755   :  { %v3031_v48 = vpop.f32.mrf.mxu0 }
 0x757   :  { %v1880_v50 = vpop.f32.mrf.mxu0 }
 0x759   :  { %v3032_v53 = vpop.f32.mrf.mxu0 }
 0x75b   :  { %v1883_v62 = vpop.f32.mrf.mxu0 }
 0x75d   :  { %v2971_v37 = vpop.f32.mrf.mxu1 }
 0x75e   :  { %v1471_v60 = vadd.f32 %v2971_v37, %v1336_v55 }
 0x75f   :  { %v1454_v39 = vpop.f32.mrf.mxu1 }
 0x760   :  { %v1469_v58 = vadd.f32 %v1454_v39, %v1328_v52  ;;  %v1611_v5 = vadd.f32 %v2991_v40, %v1471_v60 }
 0x761   :  { %v2972_v41 = vpop.f32.mrf.mxu1 }
 0x762   :  { %v1472_v0 = vadd.f32 %v2972_v41, %v1339_v59  ;;  %v1609_v2 = vadd.f32 %v1594_v42, %v1469_v58 }
 0x763   :  { %v1457_v43 = vpop.f32.mrf.mxu1 }
 0x764   :  { %v1470_v61 = vadd.f32 %v1457_v43, %v1331_v56  ;;  %v1612_v11 = vadd.f32 %v2992_v44, %v1472_v0 }
 0x766   :  { %v1610_v7 = vadd.f32 %v1597_v46, %v1470_v61 }
 0x776   :  { %v3071_v3 = vpop.f32.mrf.mxu0 }
 0x778   :  { %v2164_v15 = vpop.f32.mrf.mxu0 }
 0x77a   :  { %v3072_v21 = vpop.f32.mrf.mxu0 }
 0x77c   :  { %v2167_v29 = vpop.f32.mrf.mxu0 }
 0x77d   :  { %v3011_v45 = vpop.f32.mrf.mxu1 }
 0x77e   :  { %v1767_v10 = vadd.f32 %v3011_v45, %v1611_v5 }
 0x77f   :  { %v1750_v47 = vpop.f32.mrf.mxu1 }
 0x780   :  { %v1765_v6 = vadd.f32 %v1750_v47, %v1609_v2  ;;  %v1897_v18 = vadd.f32 %v3031_v48, %v1767_v10 }
 0x781   :  { %v3012_v49 = vpop.f32.mrf.mxu1 }
 0x782   :  { %v1768_v16 = vadd.f32 %v3012_v49, %v1612_v11  ;;  %v1895_v1 = vadd.f32 %v1880_v50, %v1765_v6 }
 0x783   :  { %v1753_v51 = vpop.f32.mrf.mxu1 }
 0x784   :  { %v1766_v12 = vadd.f32 %v1753_v51, %v1610_v7  ;;  %v1898_v24 = vadd.f32 %v3032_v53, %v1768_v16 }
 0x786   :  { %v1896_v20 = vadd.f32 %v1883_v62, %v1766_v12 }
 0x79d   :  { %v3051_v54 = vpop.f32.mrf.mxu1 }
 0x79e   :  { %v2031_v23 = vadd.f32 %v3051_v54, %v1897_v18 }
 0x79f   :  { %v2014_v63 = vpop.f32.mrf.mxu1 }
 0x7a0   :  { %v2029_v19 = vadd.f32 %v2014_v63, %v1895_v1  ;;  %v2181_v31 = vadd.f32 %v3071_v3, %v2031_v23 }
 0x7a1   :  { %v3052_v8 = vpop.f32.mrf.mxu1 }
 0x7a2   :  { %v2032_v26 = vadd.f32 %v3052_v8, %v1898_v24  ;;  %v2179_v28 = vadd.f32 %v2164_v15, %v2029_v19 }
 0x7a3   :  { %v2017_v17 = vpop.f32.mrf.mxu1 }
 0x7a4   :  { %v2030_v25 = vadd.f32 %v2017_v17, %v1896_v20  ;;  %v2182_v36 = vadd.f32 %v3072_v21, %v2032_v26 }
 0x7a6   :  { %v2180_v33 = vadd.f32 %v2167_v29, %v2030_v25  ;;  %v2379_v29 = vrot.slane %v3751_v35, 4 }
 0x7bd   :  { %v3091_v22 = vpop.f32.mrf.mxu1 }
 0x7be   :  { %v2311_v34 = vadd.f32 %v3091_v22, %v2181_v31 }
 0x7bf   :  { %v2294_v9 = vpop.f32.mrf.mxu1 }
 0x7c0   :  { %v2309_v32 = vadd.f32 %v2294_v9, %v2179_v28  ;;  %v2319_v41 = vadd.f32 %v2316_v14, %v2311_v34 }
 0x7c1   :  { %v3092_v30 = vpop.f32.mrf.mxu1 }
 0x7c2   :  { %v2317_v38 = vadd.f32 %v2316_v14, %v2309_v32  ;;  %v2312_v39 = vadd.f32 %v3092_v30, %v2182_v36  ;;  %v2392_v30 = vsub.s32 5, %v3344_v4 }
 0x7c3   :  { %v2297_v57 = vpop.f32.mrf.mxu1 }
 0x7c4   :  { %v2310_v37 = vadd.f32 %v2297_v57, %v2180_v33  ;;  %v2320_v43 = vadd.f32 %v2316_v14, %v2312_v39  ;;  %v2393_v33 = vrot.slane %v3751_v35, %v2392_v30 }
 0x7c6   :  { %v2318_v40 = vadd.f32 %v2316_v14, %v2310_v37 }
 0x7c8   :  { %v2321_v42 = vadd.f32 %v2318_v40, %v2317_v38 }
 0x7ca   :  { %v2322_v44 = vadd.f32 %v2321_v42, %v2319_v41 }
 0x7cc   :  { %v2323_v45 = vadd.f32 %v2322_v44, %v2320_v43 }
 0x7ce   :  { %v2324_v46 = vrot.slane %v2323_v45, 4 }
 0x7d0   :  { %v2325_v47 = vadd.f32 %v2324_v46, %v2323_v45 }
 0x7d2   :  { %v2326_v48 = vrot.slane %v2325_v47, 2 }
 0x7d4   :  { %v2327_v49 = vadd.f32 %v2326_v48, %v2325_v47 }
 0x7d6   :  { %v2328_v50 = vrot.slane %v2327_v49, 1 }
 0x7d8   :  { %v2329_v51 = vadd.f32 %v2328_v50, %v2327_v49 }
 0x7da   :  { %2330 = vrot.lane.b32.xlu0 %v2329_v51, %s3243_s10 }
 0x84c   :  { %v2331_v52 = vpop.permute.xlu0 %2330 }
 0x84d   :  { %v2332_v53 = vadd.f32 %v2331_v52, %v2329_v51 }
 0x84f   :  { %2333 = vrot.lane.b32.xlu1 %v2332_v53, %s3244_s11 }
 0x8c1   :  { %v2334_v54 = vpop.permute.xlu1 %2333 }
 0x8c2   :  { %v2335_v55 = vadd.f32 %v2334_v54, %v2332_v53 }
 0x8c4   :  { %2336 = vrot.lane.b32.xlu0 %v2335_v55, %s3245_s12 }
 0x936   :  { %v2337_v56 = vpop.permute.xlu0 %2336 }
 0x937   :  { %v2338_v58 = vadd.f32 %v2337_v56, %v2335_v55 }
 0x939   :  { %2339 = vrot.lane.b32.xlu1 %v2338_v58, %s3239_s18 }
 0x9ab   :  { %v2340_v59 = vpop.permute.xlu1 %2339 }
 0x9ac   :  { %v2341_v60 = vadd.f32 %v2340_v59, %v2338_v58 }
 0x9ae   :  { %v2342_v61 = vmul.f32 0.001953125, %v2341_v60 }
 0x9b0   :  { %v2346_v62 = vrot.slane %v2342_v61, %v3347_v13 }
 0x9b2   :  { %v2347_v63 = vsub.f32 %v2317_v38, %v2346_v62  ;;  %v2348_v0 = vsub.f32 %v2318_v40, %v2346_v62  ;;  %v2349_v2 = vsub.f32 %v2319_v41, %v2346_v62  ;;  %v2350_v3 = vsub.f32 %v2320_v43, %v2346_v62 }
 0x9b4   :  { %v2351_v5 = vmul.f32 %v2347_v63, %v2347_v63  ;;  %v2352_v6 = vmul.f32 %v2348_v0, %v2348_v0  ;;  %v2353_v7 = vmul.f32 %v2349_v2, %v2349_v2  ;;  %v2354_v10 = vmul.f32 %v2350_v3, %v2350_v3 }
 0x9b6   :  { %v2355_v8 = vadd.f32 %v2352_v6, %v2351_v5 }
 0x9b8   :  { %v2356_v11 = vadd.f32 %v2355_v8, %v2353_v7 }
 0x9ba   :  { %v2357_v12 = vadd.f32 %v2356_v11, %v2354_v10 }
 0x9bc   :  { %v2358_v15 = vrot.slane %v2357_v12, 4 }
 0x9be   :  { %v2359_v16 = vadd.f32 %v2358_v15, %v2357_v12 }
 0x9c0   :  { %v2360_v1 = vrot.slane %v2359_v16, 2 }
 0x9c2   :  { %v2361_v17 = vadd.f32 %v2360_v1, %v2359_v16 }
 0x9c4   :  { %v2362_v18 = vrot.slane %v2361_v17, 1 }
 0x9c6   :  { %v2363_v19 = vadd.f32 %v2362_v18, %v2361_v17 }
 0x9c8   :  { %2364 = vrot.lane.b32.xlu0 %v2363_v19, %s3243_s10 }
 0xa3a   :  { %v2365_v20 = vpop.permute.xlu0 %2364 }
 0xa3b   :  { %v2366_v21 = vadd.f32 %v2365_v20, %v2363_v19 }
 0xa3d   :  { %2367 = vrot.lane.b32.xlu1 %v2366_v21, %s3244_s11 }
 0xaaf   :  { %v2368_v22 = vpop.permute.xlu1 %2367 }
 0xab0   :  { %v2369_v23 = vadd.f32 %v2368_v22, %v2366_v21 }
 0xab2   :  { %2370 = vrot.lane.b32.xlu0 %v2369_v23, %s3245_s12 }
 0xb24   :  { %v2371_v24 = vpop.permute.xlu0 %2370 }
 0xb25   :  { %v2372_v25 = vadd.f32 %v2371_v24, %v2369_v23 }
 0xb27   :  { %2373 = vrot.lane.b32.xlu1 %v2372_v25, %s3239_s18 }
 0xb99   :  { %v2374_v9 = vpop.permute.xlu1 %2373 }
 0xb9a   :  { %v2375_v26 = vadd.f32 %v2374_v9, %v2372_v25 }
 0xb9c   :  { %v2376_v27 = vmul.f32 0.001953125, %v2375_v26 }
 0xb9e   :  { %v2377_v28 = vadd.f32 1e-05, %v2376_v27 }
 0xba0   :  { %3213 = vrsqrt.f32 %v2377_v28 }
 0xbad   :  { %v3214_v31 = vpop.eup %3213 }
 0xbae   :  { %v2381_v32 = vmul.f32 %v3214_v31, %v2379_v29 }
 0xbb0   :  { %v2385_v57 = vrot.slane %v2381_v32, %v3347_v13 }
 0xbb2   :  { %v2386_v34 = vmul.f32 %v2385_v57, %v2347_v63  ;;  %v2387_v14 = vmul.f32 %v2385_v57, %v2348_v0  ;;  %v2388_v36 = vmul.f32 %v2385_v57, %v2349_v2  ;;  %v2389_v37 = vmul.f32 %v2385_v57, %v2350_v3 }
 0xbb4   :  { %v2394_v38 = vadd.f32 %v2393_v33, %v2386_v34  ;;  %v2395_v39 = vadd.f32 %v2393_v33, %v2387_v14  ;;  %v2396_v40 = vadd.f32 %v2393_v33, %v2388_v36  ;;  %v2397_v41 = vadd.f32 %v2393_v33, %v2389_v37 }
 0xbb6   :  { %2398 = vst [vmem:[%s3783_s4] sm:$0xff] %v2394_v38  ;;  %2399 = vst [vmem:[%s3783_s4 + $0x8] sm:$0xff] %v2395_v39 }
 0xbb7   :  { %2400 = vst [vmem:[%s3783_s4 + $0x10] sm:$0xff] %v2396_v40  ;;  %2401 = vst [vmem:[%s3783_s4 + $0x18] sm:$0xff] %v2397_v41 }
 0xbb8   :  { %2406 = vsyncpa [#allocation4], 1 }

</bundles_post_ra>
